<compile_context>
chip_gen: v7x
topology: tpu7x:2x2x1
jax: 0.10.0
libtpu: 0.0.40
codegen_flags: <defaults>
</compile_context>

<pallas_src>
import jax
import jax.numpy as jnp
from jax.experimental import pallas as pl
from jax.experimental.pallas import tpu as pltpu


def _round_up(n, m=128):
    return ((n + m - 1) // m) * m


def _layernorm(y, gamma, beta, eps=1e-5):
    mu = jnp.mean(y, axis=-1, keepdims=True)
    var = jnp.mean((y - mu) ** 2, axis=-1, keepdims=True)
    return (y - mu) * jax.lax.rsqrt(var + eps) * gamma + beta


# Order in which (prepared) weights are passed to the kernel.
_WEIGHT_ORDER = ("wqkv", "bqkv", "wo", "bo", "g1", "b1",
                 "w1", "bf1", "w2", "bf2", "g2", "b2", "ow", "ob")


def make_fused_decoder_kernel(B, S, E, H, L, VP, ATP):
    """Whole batch, all L layers + vocab projection in one invocation."""
    Dh = E // H

    def kernel(x_ref,
               wqkv_ref, bqkv_ref, wo_ref, bo_ref, g1_ref, b1_ref,
               w1_ref, bf1_ref, w2_ref, bf2_ref, g2_ref, b2_ref,
               ow_ref, ob_ref,
               logits_ref, attn_ref):
        x2 = x_ref[...].reshape(B * S, E)                     # (B*S, E) f32

        # Causal mask: built once, shared by all layers/heads.
        row = jax.lax.broadcasted_iota(jnp.int32, (S, S), 0)
        col = jax.lax.broadcasted_iota(jnp.int32, (S, S), 1)
        causal = (col <= row)[None, :, :]                     # (1, S, S)

        attn_slabs = []
        for li in range(L):                                   # static unroll (L small)
            # ---- fused, lane-dense QKV projection (1/sqrt(Dh) folded in) ----
            qkv = jnp.dot(x2, wqkv_ref[li],
                          preferred_element_type=jnp.float32) + bqkv_ref[li]

            # ---- per-head attention core (inherently (S,S)-sized work) ----
            a_heads, c_heads = [], []
            for h in range(H):
                qh = qkv[:, h * Dh:(h + 1) * Dh].reshape(B, S, Dh)
                kh = qkv[:, E + h * Dh:E + (h + 1) * Dh].reshape(B, S, Dh)
                vh = qkv[:, 2 * E + h * Dh:2 * E + (h + 1) * Dh].reshape(B, S, Dh)
                s = jnp.einsum('bqd,bkd->bqk', qh, kh,
                               preferred_element_type=jnp.float32)   # (B,S,S)
                s = jnp.where(causal, s, jnp.float32(-1e9))          # masked_fill
                s = s - jnp.max(s, axis=-1, keepdims=True)
                p = jnp.exp(s)
                a = p / jnp.sum(p, axis=-1, keepdims=True)           # exact softmax
                a_heads.append(a)
                c_heads.append(jnp.einsum('bqk,bkd->bqd', a, vh,
                                          preferred_element_type=jnp.float32))
            # (B, S, H*S): lane-concat yields the lane-dense output layout for
            # the attention maps without any sublane transpose.
            attn_slabs.append(jnp.concatenate(a_heads, axis=-1))
            # (B*S, E): head-major lane-concat == PyTorch .view(B, S, H*Dh).
            ctx = jnp.concatenate(c_heads, axis=-1).reshape(B * S, E)

            # ---- output projection: one (B*S,E)@(E,E) matmul ----
            attn_out = jnp.dot(ctx, wo_ref[li],
                               preferred_element_type=jnp.float32) + bo_ref[li]
            x2 = _layernorm(x2 + attn_out, g1_ref[li], b1_ref[li])

            # ---- feed-forward (HID padded to 128 -> lane-dense matmuls) ----
            hmid = jnp.maximum(
                jnp.dot(x2, w1_ref[li], preferred_element_type=jnp.float32)
                + bf1_ref[li], 0.0)                                   # (B*S, HIDP)
            ff = jnp.dot(hmid, w2_ref[li],
                         preferred_element_type=jnp.float32) + bf2_ref[li]
            x2 = _layernorm(x2 + ff, g2_ref[li], b2_ref[li])

        # ---- vocab projection: lane-dense (VP = 128) output store ----
        logits = jnp.dot(x2, ow_ref[...],
                         preferred_element_type=jnp.float32) + ob_ref[...]
        logits_ref[...] = logits.reshape(B, S, VP)

        # ---- single lane-dense attention-map store (pad L*H*S -> 128) ----
        slab = jnp.concatenate(attn_slabs, axis=-1)           # (B, S, L*H*S)
        pad = ATP - L * H * S
        if pad:
            slab = jnp.concatenate(
                [slab, jnp.zeros((B, S, pad), jnp.float32)], axis=-1)
        attn_ref[...] = slab

    return kernel


def fused_decoder_call(x_emb, kp, meta):
    B, S, E = x_emb.shape
    L, H = meta["L"], meta["H"]
    VP = meta["vocab_pad"]
    ATP = _round_up(L * H * S)
    kernel = make_fused_decoder_kernel(B, S, E, H, L, VP, ATP)

    args = [x_emb] + [kp[name] for name in _WEIGHT_ORDER]
    # No grid: the whole (tiny) problem runs in one invocation with every
    # operand resident in VMEM (<200 KiB total).  For v7x at scale: restore
    # grid=(B,) "parallel" + an "arbitrary" layer axis with per-layer weight
    # BlockSpecs so weights are pipelined layer-by-layer instead of resident.
    vmem = pl.BlockSpec(memory_space=pltpu.MemorySpace.VMEM)
    out_shapes = (jax.ShapeDtypeStruct((B, S, VP), jnp.float32),
                  jax.ShapeDtypeStruct((B, S, ATP), jnp.float32))
    return pl.pallas_call(
        kernel,
        in_specs=[vmem] * len(args),
        out_specs=(vmem, vmem),
        out_shape=out_shapes,
    )(*args)


def transformer_decoder_forward(tokens, kp, meta):
    # Embedding lookup is a gather; kept in plain JAX glue.
    # TODO(synk): could be pulled into the kernel with a scalar-prefetch row
    # gather (pl.Element BlockSpec); pure overhead at these sizes.
    x = kp["embedding"][tokens]                               # (B, S, E)
    logits_p, attn_p = fused_decoder_call(x, kp, meta)
    B, S = tokens.shape
    L, H, V = meta["L"], meta["H"], meta["vocab"]
    logits = logits_p[:, :, :V]                               # crop vocab padding
    attn = attn_p[:, :, :L * H * S].reshape(B, S, L, H, S)
    attn = attn.transpose(0, 2, 3, 1, 4)                      # (B, L, H, S, S)
    attn_maps = [attn[:, li] for li in range(L)]              # list of (B,H,S,S)
    return logits, attn_maps


def init_torch_style_params(key, vocab, E, H, num_layers, HID=100):
    """Weights in PyTorch nn.Linear convention: W (out, in), b (out,)."""
    keys = jax.random.split(key, 2 + num_layers)

    def w(k, shape):
        return jax.random.normal(k, shape, jnp.float32) * 0.02

    params = {"embedding": w(keys[0], (vocab, E))}
    layers = []
    for li in range(num_layers):
        ks = jax.random.split(keys[2 + li], 12)
        layers.append({
            "wq": w(ks[0], (E, E)), "bq": w(ks[1], (E,)),
            "wk": w(ks[2], (E, E)), "bk": w(ks[3], (E,)),
            "wv": w(ks[4], (E, E)), "bv": w(ks[5], (E,)),
            "wo": w(ks[6], (E, E)), "bo": w(ks[7], (E,)),
            "g1": jnp.ones((E,), jnp.float32), "b1": jnp.zeros((E,), jnp.float32),
            "w1": w(ks[8], (HID, E)), "bf1": w(ks[9], (HID,)),
            "w2": w(ks[10], (E, HID)), "bf2": w(ks[11], (E,)),
            "g2": jnp.ones((E,), jnp.float32), "b2": jnp.zeros((E,), jnp.float32),
        })
    params["layers"] = layers
    params["out_w"] = w(keys[1], (vocab, E))
    params["out_b"] = jnp.zeros((vocab,), jnp.float32)
    return params


def prepare_kernel_params(tp, H):
    """One-time conversion: transpose to (in,out), fuse q|k|v into one padded
    (E,128) matrix (scale folded into q), pad HID/VOCAB to 128, stack layers."""
    V, E = tp["embedding"].shape
    Dh = E // H
    L = len(tp["layers"])
    HID = tp["layers"][0]["w1"].shape[0]
    HIDP, VP, QKVP = _round_up(HID), _round_up(V), _round_up(3 * E)
    scale = 1.0 / float(Dh) ** 0.5

    def stack(fn):
        return jnp.stack([fn(lp) for lp in tp["layers"]], axis=0)

    def fuse_qkv_w(lp):
        wf = jnp.concatenate([lp["wq"].T * scale, lp["wk"].T, lp["wv"].T], axis=1)
        return jnp.pad(wf, ((0, 0), (0, QKVP - 3 * E)))        # (E, QKVP)

    def fuse_qkv_b(lp):
        bf = jnp.concatenate([lp["bq"] * scale, lp["bk"], lp["bv"]])
        return jnp.pad(bf, (0, QKVP - 3 * E)).reshape(1, QKVP)  # (1, QKVP)

    kp = {
        "embedding": tp["embedding"],
        "wqkv": stack(fuse_qkv_w),                             # (L, E, 128)
        "bqkv": stack(fuse_qkv_b),                             # (L, 1, 128)
        "wo": stack(lambda lp: lp["wo"].T),                    # (L, E, E)
        "bo": stack(lambda lp: lp["bo"].reshape(1, E)),
        "g1": stack(lambda lp: lp["g1"].reshape(1, E)),
        "b1": stack(lambda lp: lp["b1"].reshape(1, E)),
        "w1": stack(lambda lp: jnp.pad(lp["w1"].T, ((0, 0), (0, HIDP - HID)))),
        "bf1": stack(lambda lp: jnp.pad(lp["bf1"], (0, HIDP - HID)).reshape(1, HIDP)),
        "w2": stack(lambda lp: jnp.pad(lp["w2"].T, ((0, HIDP - HID), (0, 0)))),
        "bf2": stack(lambda lp: lp["bf2"].reshape(1, E)),
        "g2": stack(lambda lp: lp["g2"].reshape(1, E)),
        "b2": stack(lambda lp: lp["b2"].reshape(1, E)),
        "ow": jnp.pad(tp["out_w"].T, ((0, 0), (0, VP - V))),   # (E, VP)
        "ob": jnp.pad(tp["out_b"], (0, VP - V)).reshape(1, VP),
    }
    meta = dict(L=L, H=H, E=E, Dh=Dh, vocab=V, hid=HID, hid_pad=HIDP, vocab_pad=VP)
    return kp, meta


def reference_forward(tokens, tp, H):
    """Plain-JAX mirror of the PyTorch TransformerDecoder (f32, exact)."""
    hp = jax.lax.Precision.HIGHEST
    x = tp["embedding"][tokens]
    B, S, E = x.shape
    Dh = E // H
    mask = jnp.tril(jnp.ones((S, S), jnp.float32))[None, None]

    def lin(z, w, b):
        return jnp.dot(z, w.T, precision=hp) + b

    attn_maps = []
    for lp in tp["layers"]:
        q = lin(x, lp["wq"], lp["bq"]).reshape(B, S, H, Dh).transpose(0, 2, 1, 3)
        k = lin(x, lp["wk"], lp["bk"]).reshape(B, S, H, Dh).transpose(0, 2, 1, 3)
        v = lin(x, lp["wv"], lp["bv"]).reshape(B, S, H, Dh).transpose(0, 2, 1, 3)
        scores = jnp.einsum('bhqd,bhkd->bhqk', q, k, precision=hp) / jnp.sqrt(
            jnp.float32(Dh))
        scores = jnp.where(mask == 0, jnp.float32(-1e9), scores)
        attn = jax.nn.softmax(scores, axis=-1)
        attn_maps.append(attn)
        ctx = jnp.einsum('bhqk,bhkd->bhqd', attn, v,
                         precision=hp).transpose(0, 2, 1, 3).reshape(B, S, E)
        x = _layernorm(x + lin(ctx, lp["wo"], lp["bo"]), lp["g1"], lp["b1"])
        h1 = jax.nn.relu(lin(x, lp["w1"], lp["bf1"]))
        x = _layernorm(x + lin(h1, lp["w2"], lp["bf2"]), lp["g2"], lp["b2"])
    logits = lin(x, tp["out_w"], tp["out_b"])
    return logits, attn_maps


if __name__ == "__main__":
    VOCAB, E, H, L = 50, 32, 4, 2
    B, S = 2, 8

    key = jax.random.PRNGKey(0)
    pkey, tkey = jax.random.split(key)
    tparams = init_torch_style_params(pkey, VOCAB, E, H, L)
    kp, meta = prepare_kernel_params(tparams, H)
    tokens = jax.random.randint(tkey, (B, S), 0, VOCAB, dtype=jnp.int32)

    logits, attn_maps = transformer_decoder_forward(tokens, kp, meta)
    jax.block_until_ready(logits)
    for a in attn_maps:
        jax.block_until_ready(a)

    assert logits.shape == (B, S, VOCAB)
    assert len(attn_maps) == L
    assert all(a.shape == (B, H, S, S) for a in attn_maps)

    # Parity check against a plain-JAX mirror of the PyTorch module
    # (loose tolerance to cover MXU precision modes; catches structural bugs).
    ref_logits, ref_attn = reference_forward(tokens, tparams, H)
    assert float(jnp.max(jnp.abs(logits - ref_logits))) < 2e-2
    for a, r in zip(attn_maps, ref_attn):
        assert float(jnp.max(jnp.abs(a - r))) < 2e-2

    print("KERNEL_OK")
</pallas_src>

<mosaic_0001>
module attributes {stable_mosaic.version = 11 : i64} {
  func.func @kernel(%arg0: memref<2x8x32xf32, #tpu.memory_space<vmem>>, %arg1: memref<2x32x128xf32, #tpu.memory_space<vmem>>, %arg2: memref<2x1x128xf32, #tpu.memory_space<vmem>>, %arg3: memref<2x32x32xf32, #tpu.memory_space<vmem>>, %arg4: memref<2x1x32xf32, #tpu.memory_space<vmem>>, %arg5: memref<2x1x32xf32, #tpu.memory_space<vmem>>, %arg6: memref<2x1x32xf32, #tpu.memory_space<vmem>>, %arg7: memref<2x32x128xf32, #tpu.memory_space<vmem>>, %arg8: memref<2x1x128xf32, #tpu.memory_space<vmem>>, %arg9: memref<2x128x32xf32, #tpu.memory_space<vmem>>, %arg10: memref<2x1x32xf32, #tpu.memory_space<vmem>>, %arg11: memref<2x1x32xf32, #tpu.memory_space<vmem>>, %arg12: memref<2x1x32xf32, #tpu.memory_space<vmem>>, %arg13: memref<32x128xf32, #tpu.memory_space<vmem>>, %arg14: memref<1x128xf32, #tpu.memory_space<vmem>>, %arg15: memref<2x8x128xf32, #tpu.memory_space<vmem>>, %arg16: memref<2x8x128xf32, #tpu.memory_space<vmem>>) attributes {dimension_semantics = [], scalar_prefetch = 0 : i64, scratch_operands = 0 : i64, tpu.core_type = #tpu.core_type<tc>} {
    %c0 = arith.constant 0 : index
    %c0_0 = arith.constant 0 : index
    %c0_1 = arith.constant 0 : index
    %0 = vector.load %arg0[%c0, %c0_0, %c0_1] : memref<2x8x32xf32, #tpu.memory_space<vmem>>, vector<2x8x32xf32>
    %1 = vector.shape_cast %0 : vector<2x8x32xf32> to vector<16x32xf32>
    %2 = tpu.iota {dimensions = array<i32: 0>} : vector<8x8xi32>
    %3 = tpu.iota {dimensions = array<i32: 1>} : vector<8x8xi32>
    %4 = arith.cmpi sle, %3, %2 : vector<8x8xi32>
    %5 = vector.shape_cast %4 : vector<8x8xi1> to vector<1x8x8xi1>
    %c0_2 = arith.constant 0 : index
    %c0_3 = arith.constant 0 : index
    %c0_4 = arith.constant 0 : index
    %6 = vector.load %arg1[%c0_2, %c0_3, %c0_4] : memref<2x32x128xf32, #tpu.memory_space<vmem>>, vector<1x32x128xf32>
    %7 = vector.shape_cast %6 : vector<1x32x128xf32> to vector<32x128xf32>
    %cst = arith.constant dense<0.000000e+00> : vector<16x128xf32>
    %8 = tpu.matmul %1, %7, %cst {dimension_numbers = #tpu.dot_dimension_numbers<[1], [0], [0], [1], [0, 0, 1, 1], [], []>} : vector<16x32xf32>, vector<32x128xf32>, vector<16x128xf32> -> vector<16x128xf32>
    %c0_5 = arith.constant 0 : index
    %c0_6 = arith.constant 0 : index
    %c0_7 = arith.constant 0 : index
    %9 = vector.load %arg2[%c0_5, %c0_6, %c0_7] : memref<2x1x128xf32, #tpu.memory_space<vmem>>, vector<1x1x128xf32>
    %10 = vector.shape_cast %9 : vector<1x1x128xf32> to vector<1x128xf32>
    %11 = vector.broadcast %10 : vector<1x128xf32> to vector<16x128xf32>
    %12 = arith.addf %8, %11 : vector<16x128xf32>
    %13 = vector.extract_strided_slice %12 {offsets = [0, 0], sizes = [16, 8], strides = [1, 1]} : vector<16x128xf32> to vector<16x8xf32>
    %14 = vector.shape_cast %13 : vector<16x8xf32> to vector<2x8x8xf32>
    %15 = vector.extract_strided_slice %12 {offsets = [0, 32], sizes = [16, 8], strides = [1, 1]} : vector<16x128xf32> to vector<16x8xf32>
    %16 = vector.shape_cast %15 : vector<16x8xf32> to vector<2x8x8xf32>
    %17 = vector.extract_strided_slice %12 {offsets = [0, 64], sizes = [16, 8], strides = [1, 1]} : vector<16x128xf32> to vector<16x8xf32>
    %18 = vector.shape_cast %17 : vector<16x8xf32> to vector<2x8x8xf32>
    "tpu.trace_start"() <{level = 10 : i32, message = "bqd,bkd->bqk"}> : () -> ()
    %cst_8 = arith.constant dense<0.000000e+00> : vector<2x8x8xf32>
    %19 = tpu.matmul %14, %16, %cst_8 {dimension_numbers = #tpu.dot_dimension_numbers<[2], [2], [1], [1], [0, 0, 0, 1, 1, 1], [0], [0]>} : vector<2x8x8xf32>, vector<2x8x8xf32>, vector<2x8x8xf32> -> vector<2x8x8xf32>
    %cst_9 = arith.constant -1.000000e+09 : f32
    "tpu.trace_stop"() : () -> ()
    %20 = vector.shape_cast %5 : vector<1x8x8xi1> to vector<1x8x8xi1>
    %21 = vector.broadcast %20 : vector<1x8x8xi1> to vector<2x8x8xi1>
    %22 = vector.broadcast %cst_9 : f32 to vector<2x8x8xf32>
    %23 = arith.select %21, %19, %22 : vector<2x8x8xi1>, vector<2x8x8xf32>
    %cst_10 = arith.constant dense<0xFF800000> : vector<2x8xf32>
    %24 = vector.multi_reduction <maximumf>, %23, %cst_10 [2] : vector<2x8x8xf32> to vector<2x8xf32>
    %25 = vector.shape_cast %24 : vector<2x8xf32> to vector<2x8x1xf32>
    %26 = vector.broadcast %25 : vector<2x8x1xf32> to vector<2x8x8xf32>
    %27 = arith.subf %23, %26 : vector<2x8x8xf32>
    %28 = math.exp %27 : vector<2x8x8xf32>
    %cst_11 = arith.constant dense<0.000000e+00> : vector<2x8xf32>
    %29 = vector.multi_reduction <add>, %28, %cst_11 [2] : vector<2x8x8xf32> to vector<2x8xf32>
    %30 = vector.shape_cast %29 : vector<2x8xf32> to vector<2x8x1xf32>
    %31 = vector.broadcast %30 : vector<2x8x1xf32> to vector<2x8x8xf32>
    %32 = arith.divf %28, %31 : vector<2x8x8xf32>
    "tpu.trace_start"() <{level = 10 : i32, message = "bqk,bkd->bqd"}> : () -> ()
    %cst_12 = arith.constant dense<0.000000e+00> : vector<2x8x8xf32>
    %33 = tpu.matmul %32, %18, %cst_12 {dimension_numbers = #tpu.dot_dimension_numbers<[2], [1], [1], [2], [0, 0, 0, 1, 1, 2], [0], [0]>} : vector<2x8x8xf32>, vector<2x8x8xf32>, vector<2x8x8xf32> -> vector<2x8x8xf32>
    "tpu.trace_stop"() : () -> ()
    %34 = vector.extract_strided_slice %12 {offsets = [0, 8], sizes = [16, 8], strides = [1, 1]} : vector<16x128xf32> to vector<16x8xf32>
    %35 = vector.shape_cast %34 : vector<16x8xf32> to vector<2x8x8xf32>
    %36 = vector.extract_strided_slice %12 {offsets = [0, 40], sizes = [16, 8], strides = [1, 1]} : vector<16x128xf32> to vector<16x8xf32>
    %37 = vector.shape_cast %36 : vector<16x8xf32> to vector<2x8x8xf32>
    %38 = vector.extract_strided_slice %12 {offsets = [0, 72], sizes = [16, 8], strides = [1, 1]} : vector<16x128xf32> to vector<16x8xf32>
    %39 = vector.shape_cast %38 : vector<16x8xf32> to vector<2x8x8xf32>
    "tpu.trace_start"() <{level = 10 : i32, message = "bqd,bkd->bqk"}> : () -> ()
    %cst_13 = arith.constant dense<0.000000e+00> : vector<2x8x8xf32>
    %40 = tpu.matmul %35, %37, %cst_13 {dimension_numbers = #tpu.dot_dimension_numbers<[2], [2], [1], [1], [0, 0, 0, 1, 1, 1], [0], [0]>} : vector<2x8x8xf32>, vector<2x8x8xf32>, vector<2x8x8xf32> -> vector<2x8x8xf32>
    %cst_14 = arith.constant -1.000000e+09 : f32
    "tpu.trace_stop"() : () -> ()
    %41 = vector.shape_cast %5 : vector<1x8x8xi1> to vector<1x8x8xi1>
    %42 = vector.broadcast %41 : vector<1x8x8xi1> to vector<2x8x8xi1>
    %43 = vector.broadcast %cst_14 : f32 to vector<2x8x8xf32>
    %44 = arith.select %42, %40, %43 : vector<2x8x8xi1>, vector<2x8x8xf32>
    %cst_15 = arith.constant dense<0xFF800000> : vector<2x8xf32>
    %45 = vector.multi_reduction <maximumf>, %44, %cst_15 [2] : vector<2x8x8xf32> to vector<2x8xf32>
    %46 = vector.shape_cast %45 : vector<2x8xf32> to vector<2x8x1xf32>
    %47 = vector.broadcast %46 : vector<2x8x1xf32> to vector<2x8x8xf32>
    %48 = arith.subf %44, %47 : vector<2x8x8xf32>
    %49 = math.exp %48 : vector<2x8x8xf32>
    %cst_16 = arith.constant dense<0.000000e+00> : vector<2x8xf32>
    %50 = vector.multi_reduction <add>, %49, %cst_16 [2] : vector<2x8x8xf32> to vector<2x8xf32>
    %51 = vector.shape_cast %50 : vector<2x8xf32> to vector<2x8x1xf32>
    %52 = vector.broadcast %51 : vector<2x8x1xf32> to vector<2x8x8xf32>
    %53 = arith.divf %49, %52 : vector<2x8x8xf32>
    "tpu.trace_start"() <{level = 10 : i32, message = "bqk,bkd->bqd"}> : () -> ()
    %cst_17 = arith.constant dense<0.000000e+00> : vector<2x8x8xf32>
    %54 = tpu.matmul %53, %39, %cst_17 {dimension_numbers = #tpu.dot_dimension_numbers<[2], [1], [1], [2], [0, 0, 0, 1, 1, 2], [0], [0]>} : vector<2x8x8xf32>, vector<2x8x8xf32>, vector<2x8x8xf32> -> vector<2x8x8xf32>
    "tpu.trace_stop"() : () -> ()
    %55 = vector.extract_strided_slice %12 {offsets = [0, 16], sizes = [16, 8], strides = [1, 1]} : vector<16x128xf32> to vector<16x8xf32>
    %56 = vector.shape_cast %55 : vector<16x8xf32> to vector<2x8x8xf32>
    %57 = vector.extract_strided_slice %12 {offsets = [0, 48], sizes = [16, 8], strides = [1, 1]} : vector<16x128xf32> to vector<16x8xf32>
    %58 = vector.shape_cast %57 : vector<16x8xf32> to vector<2x8x8xf32>
    %59 = vector.extract_strided_slice %12 {offsets = [0, 80], sizes = [16, 8], strides = [1, 1]} : vector<16x128xf32> to vector<16x8xf32>
    %60 = vector.shape_cast %59 : vector<16x8xf32> to vector<2x8x8xf32>
    "tpu.trace_start"() <{level = 10 : i32, message = "bqd,bkd->bqk"}> : () -> ()
    %cst_18 = arith.constant dense<0.000000e+00> : vector<2x8x8xf32>
    %61 = tpu.matmul %56, %58, %cst_18 {dimension_numbers = #tpu.dot_dimension_numbers<[2], [2], [1], [1], [0, 0, 0, 1, 1, 1], [0], [0]>} : vector<2x8x8xf32>, vector<2x8x8xf32>, vector<2x8x8xf32> -> vector<2x8x8xf32>
    %cst_19 = arith.constant -1.000000e+09 : f32
    "tpu.trace_stop"() : () -> ()
    %62 = vector.shape_cast %5 : vector<1x8x8xi1> to vector<1x8x8xi1>
    %63 = vector.broadcast %62 : vector<1x8x8xi1> to vector<2x8x8xi1>
    %64 = vector.broadcast %cst_19 : f32 to vector<2x8x8xf32>
    %65 = arith.select %63, %61, %64 : vector<2x8x8xi1>, vector<2x8x8xf32>
    %cst_20 = arith.constant dense<0xFF800000> : vector<2x8xf32>
    %66 = vector.multi_reduction <maximumf>, %65, %cst_20 [2] : vector<2x8x8xf32> to vector<2x8xf32>
    %67 = vector.shape_cast %66 : vector<2x8xf32> to vector<2x8x1xf32>
    %68 = vector.broadcast %67 : vector<2x8x1xf32> to vector<2x8x8xf32>
    %69 = arith.subf %65, %68 : vector<2x8x8xf32>
    %70 = math.exp %69 : vector<2x8x8xf32>
    %cst_21 = arith.constant dense<0.000000e+00> : vector<2x8xf32>
    %71 = vector.multi_reduction <add>, %70, %cst_21 [2] : vector<2x8x8xf32> to vector<2x8xf32>
    %72 = vector.shape_cast %71 : vector<2x8xf32> to vector<2x8x1xf32>
    %73 = vector.broadcast %72 : vector<2x8x1xf32> to vector<2x8x8xf32>
    %74 = arith.divf %70, %73 : vector<2x8x8xf32>
    "tpu.trace_start"() <{level = 10 : i32, message = "bqk,bkd->bqd"}> : () -> ()
    %cst_22 = arith.constant dense<0.000000e+00> : vector<2x8x8xf32>
    %75 = tpu.matmul %74, %60, %cst_22 {dimension_numbers = #tpu.dot_dimension_numbers<[2], [1], [1], [2], [0, 0, 0, 1, 1, 2], [0], [0]>} : vector<2x8x8xf32>, vector<2x8x8xf32>, vector<2x8x8xf32> -> vector<2x8x8xf32>
    "tpu.trace_stop"() : () -> ()
    %76 = vector.extract_strided_slice %12 {offsets = [0, 24], sizes = [16, 8], strides = [1, 1]} : vector<16x128xf32> to vector<16x8xf32>
    %77 = vector.shape_cast %76 : vector<16x8xf32> to vector<2x8x8xf32>
    %78 = vector.extract_strided_slice %12 {offsets = [0, 56], sizes = [16, 8], strides = [1, 1]} : vector<16x128xf32> to vector<16x8xf32>
    %79 = vector.shape_cast %78 : vector<16x8xf32> to vector<2x8x8xf32>
    %80 = vector.extract_strided_slice %12 {offsets = [0, 88], sizes = [16, 8], strides = [1, 1]} : vector<16x128xf32> to vector<16x8xf32>
    %81 = vector.shape_cast %80 : vector<16x8xf32> to vector<2x8x8xf32>
    "tpu.trace_start"() <{level = 10 : i32, message = "bqd,bkd->bqk"}> : () -> ()
    %cst_23 = arith.constant dense<0.000000e+00> : vector<2x8x8xf32>
    %82 = tpu.matmul %77, %79, %cst_23 {dimension_numbers = #tpu.dot_dimension_numbers<[2], [2], [1], [1], [0, 0, 0, 1, 1, 1], [0], [0]>} : vector<2x8x8xf32>, vector<2x8x8xf32>, vector<2x8x8xf32> -> vector<2x8x8xf32>
    %cst_24 = arith.constant -1.000000e+09 : f32
    "tpu.trace_stop"() : () -> ()
    %83 = vector.shape_cast %5 : vector<1x8x8xi1> to vector<1x8x8xi1>
    %84 = vector.broadcast %83 : vector<1x8x8xi1> to vector<2x8x8xi1>
    %85 = vector.broadcast %cst_24 : f32 to vector<2x8x8xf32>
    %86 = arith.select %84, %82, %85 : vector<2x8x8xi1>, vector<2x8x8xf32>
    %cst_25 = arith.constant dense<0xFF800000> : vector<2x8xf32>
    %87 = vector.multi_reduction <maximumf>, %86, %cst_25 [2] : vector<2x8x8xf32> to vector<2x8xf32>
    %88 = vector.shape_cast %87 : vector<2x8xf32> to vector<2x8x1xf32>
    %89 = vector.broadcast %88 : vector<2x8x1xf32> to vector<2x8x8xf32>
    %90 = arith.subf %86, %89 : vector<2x8x8xf32>
    %91 = math.exp %90 : vector<2x8x8xf32>
    %cst_26 = arith.constant dense<0.000000e+00> : vector<2x8xf32>
    %92 = vector.multi_reduction <add>, %91, %cst_26 [2] : vector<2x8x8xf32> to vector<2x8xf32>
    %93 = vector.shape_cast %92 : vector<2x8xf32> to vector<2x8x1xf32>
    %94 = vector.broadcast %93 : vector<2x8x1xf32> to vector<2x8x8xf32>
    %95 = arith.divf %91, %94 : vector<2x8x8xf32>
    "tpu.trace_start"() <{level = 10 : i32, message = "bqk,bkd->bqd"}> : () -> ()
    %cst_27 = arith.constant dense<0.000000e+00> : vector<2x8x8xf32>
    %96 = tpu.matmul %95, %81, %cst_27 {dimension_numbers = #tpu.dot_dimension_numbers<[2], [1], [1], [2], [0, 0, 0, 1, 1, 2], [0], [0]>} : vector<2x8x8xf32>, vector<2x8x8xf32>, vector<2x8x8xf32> -> vector<2x8x8xf32>
    "tpu.trace_stop"() : () -> ()
    %97 = tpu.concatenate %32, %53, %74, %95 in 2 : vector<2x8x8xf32>, vector<2x8x8xf32>, vector<2x8x8xf32>, vector<2x8x8xf32> -> vector<2x8x32xf32>
    %98 = tpu.concatenate %33, %54, %75, %96 in 2 : vector<2x8x8xf32>, vector<2x8x8xf32>, vector<2x8x8xf32>, vector<2x8x8xf32> -> vector<2x8x32xf32>
    %99 = vector.shape_cast %98 : vector<2x8x32xf32> to vector<16x32xf32>
    %c0_28 = arith.constant 0 : index
    %c0_29 = arith.constant 0 : index
    %c0_30 = arith.constant 0 : index
    %100 = vector.load %arg3[%c0_28, %c0_29, %c0_30] : memref<2x32x32xf32, #tpu.memory_space<vmem>>, vector<1x32x32xf32>
    %101 = vector.shape_cast %100 : vector<1x32x32xf32> to vector<32x32xf32>
    %cst_31 = arith.constant dense<0.000000e+00> : vector<16x32xf32>
    %102 = tpu.matmul %99, %101, %cst_31 {dimension_numbers = #tpu.dot_dimension_numbers<[1], [0], [0], [1], [0, 0, 1, 1], [], []>} : vector<16x32xf32>, vector<32x32xf32>, vector<16x32xf32> -> vector<16x32xf32>
    %c0_32 = arith.constant 0 : index
    %c0_33 = arith.constant 0 : index
    %c0_34 = arith.constant 0 : index
    %103 = vector.load %arg4[%c0_32, %c0_33, %c0_34] : memref<2x1x32xf32, #tpu.memory_space<vmem>>, vector<1x1x32xf32>
    %104 = vector.shape_cast %103 : vector<1x1x32xf32> to vector<1x32xf32>
    %105 = vector.broadcast %104 : vector<1x32xf32> to vector<16x32xf32>
    %106 = arith.addf %102, %105 : vector<16x32xf32>
    %107 = arith.addf %1, %106 : vector<16x32xf32>
    %c0_35 = arith.constant 0 : index
    %c0_36 = arith.constant 0 : index
    %c0_37 = arith.constant 0 : index
    %108 = vector.load %arg5[%c0_35, %c0_36, %c0_37] : memref<2x1x32xf32, #tpu.memory_space<vmem>>, vector<1x1x32xf32>
    %109 = vector.shape_cast %108 : vector<1x1x32xf32> to vector<1x32xf32>
    %c0_38 = arith.constant 0 : index
    %c0_39 = arith.constant 0 : index
    %c0_40 = arith.constant 0 : index
    %110 = vector.load %arg6[%c0_38, %c0_39, %c0_40] : memref<2x1x32xf32, #tpu.memory_space<vmem>>, vector<1x1x32xf32>
    %111 = vector.shape_cast %110 : vector<1x1x32xf32> to vector<1x32xf32>
    %cst_41 = arith.constant dense<0.000000e+00> : vector<16xf32>
    %112 = vector.multi_reduction <add>, %107, %cst_41 [1] : vector<16x32xf32> to vector<16xf32>
    %113 = vector.shape_cast %112 : vector<16xf32> to vector<16x1xf32>
    %cst_42 = arith.constant 3.200000e+01 : f32
    %114 = vector.broadcast %cst_42 : f32 to vector<16x1xf32>
    %115 = arith.divf %113, %114 : vector<16x1xf32>
    %116 = vector.broadcast %115 : vector<16x1xf32> to vector<16x32xf32>
    %117 = arith.subf %107, %116 : vector<16x32xf32>
    %118 = arith.mulf %117, %117 : vector<16x32xf32>
    %cst_43 = arith.constant dense<0.000000e+00> : vector<16xf32>
    %119 = vector.multi_reduction <add>, %118, %cst_43 [1] : vector<16x32xf32> to vector<16xf32>
    %120 = vector.shape_cast %119 : vector<16xf32> to vector<16x1xf32>
    %cst_44 = arith.constant 3.200000e+01 : f32
    %121 = vector.broadcast %cst_44 : f32 to vector<16x1xf32>
    %122 = arith.divf %120, %121 : vector<16x1xf32>
    %123 = vector.broadcast %115 : vector<16x1xf32> to vector<16x32xf32>
    %124 = arith.subf %107, %123 : vector<16x32xf32>
    %cst_45 = arith.constant 9.99999974E-6 : f32
    %125 = vector.broadcast %cst_45 : f32 to vector<16x1xf32>
    %126 = arith.addf %122, %125 : vector<16x1xf32>
    %127 = math.rsqrt %126 : vector<16x1xf32>
    %128 = vector.broadcast %127 : vector<16x1xf32> to vector<16x32xf32>
    %129 = arith.mulf %124, %128 : vector<16x32xf32>
    %130 = vector.broadcast %109 : vector<1x32xf32> to vector<16x32xf32>
    %131 = arith.mulf %129, %130 : vector<16x32xf32>
    %132 = vector.broadcast %111 : vector<1x32xf32> to vector<16x32xf32>
    %133 = arith.addf %131, %132 : vector<16x32xf32>
    %c0_46 = arith.constant 0 : index
    %c0_47 = arith.constant 0 : index
    %c0_48 = arith.constant 0 : index
    %134 = vector.load %arg7[%c0_46, %c0_47, %c0_48] : memref<2x32x128xf32, #tpu.memory_space<vmem>>, vector<1x32x128xf32>
    %135 = vector.shape_cast %134 : vector<1x32x128xf32> to vector<32x128xf32>
    %cst_49 = arith.constant dense<0.000000e+00> : vector<16x128xf32>
    %136 = tpu.matmul %133, %135, %cst_49 {dimension_numbers = #tpu.dot_dimension_numbers<[1], [0], [0], [1], [0, 0, 1, 1], [], []>} : vector<16x32xf32>, vector<32x128xf32>, vector<16x128xf32> -> vector<16x128xf32>
    %c0_50 = arith.constant 0 : index
    %c0_51 = arith.constant 0 : index
    %c0_52 = arith.constant 0 : index
    %137 = vector.load %arg8[%c0_50, %c0_51, %c0_52] : memref<2x1x128xf32, #tpu.memory_space<vmem>>, vector<1x1x128xf32>
    %138 = vector.shape_cast %137 : vector<1x1x128xf32> to vector<1x128xf32>
    %139 = vector.broadcast %138 : vector<1x128xf32> to vector<16x128xf32>
    %140 = arith.addf %136, %139 : vector<16x128xf32>
    %cst_53 = arith.constant 0.000000e+00 : f32
    %141 = vector.broadcast %cst_53 : f32 to vector<16x128xf32>
    %142 = arith.maximumf %140, %141 : vector<16x128xf32>
    %c0_54 = arith.constant 0 : index
    %c0_55 = arith.constant 0 : index
    %c0_56 = arith.constant 0 : index
    %143 = vector.load %arg9[%c0_54, %c0_55, %c0_56] : memref<2x128x32xf32, #tpu.memory_space<vmem>>, vector<1x128x32xf32>
    %144 = vector.shape_cast %143 : vector<1x128x32xf32> to vector<128x32xf32>
    %cst_57 = arith.constant dense<0.000000e+00> : vector<16x32xf32>
    %145 = tpu.matmul %142, %144, %cst_57 {dimension_numbers = #tpu.dot_dimension_numbers<[1], [0], [0], [1], [0, 0, 1, 1], [], []>} : vector<16x128xf32>, vector<128x32xf32>, vector<16x32xf32> -> vector<16x32xf32>
    %c0_58 = arith.constant 0 : index
    %c0_59 = arith.constant 0 : index
    %c0_60 = arith.constant 0 : index
    %146 = vector.load %arg10[%c0_58, %c0_59, %c0_60] : memref<2x1x32xf32, #tpu.memory_space<vmem>>, vector<1x1x32xf32>
    %147 = vector.shape_cast %146 : vector<1x1x32xf32> to vector<1x32xf32>
    %148 = vector.broadcast %147 : vector<1x32xf32> to vector<16x32xf32>
    %149 = arith.addf %145, %148 : vector<16x32xf32>
    %150 = arith.addf %133, %149 : vector<16x32xf32>
    %c0_61 = arith.constant 0 : index
    %c0_62 = arith.constant 0 : index
    %c0_63 = arith.constant 0 : index
    %151 = vector.load %arg11[%c0_61, %c0_62, %c0_63] : memref<2x1x32xf32, #tpu.memory_space<vmem>>, vector<1x1x32xf32>
    %152 = vector.shape_cast %151 : vector<1x1x32xf32> to vector<1x32xf32>
    %c0_64 = arith.constant 0 : index
    %c0_65 = arith.constant 0 : index
    %c0_66 = arith.constant 0 : index
    %153 = vector.load %arg12[%c0_64, %c0_65, %c0_66] : memref<2x1x32xf32, #tpu.memory_space<vmem>>, vector<1x1x32xf32>
    %154 = vector.shape_cast %153 : vector<1x1x32xf32> to vector<1x32xf32>
    %cst_67 = arith.constant dense<0.000000e+00> : vector<16xf32>
    %155 = vector.multi_reduction <add>, %150, %cst_67 [1] : vector<16x32xf32> to vector<16xf32>
    %156 = vector.shape_cast %155 : vector<16xf32> to vector<16x1xf32>
    %cst_68 = arith.constant 3.200000e+01 : f32
    %157 = vector.broadcast %cst_68 : f32 to vector<16x1xf32>
    %158 = arith.divf %156, %157 : vector<16x1xf32>
    %159 = vector.broadcast %158 : vector<16x1xf32> to vector<16x32xf32>
    %160 = arith.subf %150, %159 : vector<16x32xf32>
    %161 = arith.mulf %160, %160 : vector<16x32xf32>
    %cst_69 = arith.constant dense<0.000000e+00> : vector<16xf32>
    %162 = vector.multi_reduction <add>, %161, %cst_69 [1] : vector<16x32xf32> to vector<16xf32>
    %163 = vector.shape_cast %162 : vector<16xf32> to vector<16x1xf32>
    %cst_70 = arith.constant 3.200000e+01 : f32
    %164 = vector.broadcast %cst_70 : f32 to vector<16x1xf32>
    %165 = arith.divf %163, %164 : vector<16x1xf32>
    %166 = vector.broadcast %158 : vector<16x1xf32> to vector<16x32xf32>
    %167 = arith.subf %150, %166 : vector<16x32xf32>
    %cst_71 = arith.constant 9.99999974E-6 : f32
    %168 = vector.broadcast %cst_71 : f32 to vector<16x1xf32>
    %169 = arith.addf %165, %168 : vector<16x1xf32>
    %170 = math.rsqrt %169 : vector<16x1xf32>
    %171 = vector.broadcast %170 : vector<16x1xf32> to vector<16x32xf32>
    %172 = arith.mulf %167, %171 : vector<16x32xf32>
    %173 = vector.broadcast %152 : vector<1x32xf32> to vector<16x32xf32>
    %174 = arith.mulf %172, %173 : vector<16x32xf32>
    %175 = vector.broadcast %154 : vector<1x32xf32> to vector<16x32xf32>
    %176 = arith.addf %174, %175 : vector<16x32xf32>
    %c1 = arith.constant 1 : index
    %c0_72 = arith.constant 0 : index
    %c0_73 = arith.constant 0 : index
    %177 = vector.load %arg1[%c1, %c0_72, %c0_73] : memref<2x32x128xf32, #tpu.memory_space<vmem>>, vector<1x32x128xf32>
    %178 = vector.shape_cast %177 : vector<1x32x128xf32> to vector<32x128xf32>
    %cst_74 = arith.constant dense<0.000000e+00> : vector<16x128xf32>
    %179 = tpu.matmul %176, %178, %cst_74 {dimension_numbers = #tpu.dot_dimension_numbers<[1], [0], [0], [1], [0, 0, 1, 1], [], []>} : vector<16x32xf32>, vector<32x128xf32>, vector<16x128xf32> -> vector<16x128xf32>
    %c1_75 = arith.constant 1 : index
    %c0_76 = arith.constant 0 : index
    %c0_77 = arith.constant 0 : index
    %180 = vector.load %arg2[%c1_75, %c0_76, %c0_77] : memref<2x1x128xf32, #tpu.memory_space<vmem>>, vector<1x1x128xf32>
    %181 = vector.shape_cast %180 : vector<1x1x128xf32> to vector<1x128xf32>
    %182 = vector.broadcast %181 : vector<1x128xf32> to vector<16x128xf32>
    %183 = arith.addf %179, %182 : vector<16x128xf32>
    %184 = vector.extract_strided_slice %183 {offsets = [0, 0], sizes = [16, 8], strides = [1, 1]} : vector<16x128xf32> to vector<16x8xf32>
    %185 = vector.shape_cast %184 : vector<16x8xf32> to vector<2x8x8xf32>
    %186 = vector.extract_strided_slice %183 {offsets = [0, 32], sizes = [16, 8], strides = [1, 1]} : vector<16x128xf32> to vector<16x8xf32>
    %187 = vector.shape_cast %186 : vector<16x8xf32> to vector<2x8x8xf32>
    %188 = vector.extract_strided_slice %183 {offsets = [0, 64], sizes = [16, 8], strides = [1, 1]} : vector<16x128xf32> to vector<16x8xf32>
    %189 = vector.shape_cast %188 : vector<16x8xf32> to vector<2x8x8xf32>
    "tpu.trace_start"() <{level = 10 : i32, message = "bqd,bkd->bqk"}> : () -> ()
    %cst_78 = arith.constant dense<0.000000e+00> : vector<2x8x8xf32>
    %190 = tpu.matmul %185, %187, %cst_78 {dimension_numbers = #tpu.dot_dimension_numbers<[2], [2], [1], [1], [0, 0, 0, 1, 1, 1], [0], [0]>} : vector<2x8x8xf32>, vector<2x8x8xf32>, vector<2x8x8xf32> -> vector<2x8x8xf32>
    %cst_79 = arith.constant -1.000000e+09 : f32
    "tpu.trace_stop"() : () -> ()
    %191 = vector.shape_cast %5 : vector<1x8x8xi1> to vector<1x8x8xi1>
    %192 = vector.broadcast %191 : vector<1x8x8xi1> to vector<2x8x8xi1>
    %193 = vector.broadcast %cst_79 : f32 to vector<2x8x8xf32>
    %194 = arith.select %192, %190, %193 : vector<2x8x8xi1>, vector<2x8x8xf32>
    %cst_80 = arith.constant dense<0xFF800000> : vector<2x8xf32>
    %195 = vector.multi_reduction <maximumf>, %194, %cst_80 [2] : vector<2x8x8xf32> to vector<2x8xf32>
    %196 = vector.shape_cast %195 : vector<2x8xf32> to vector<2x8x1xf32>
    %197 = vector.broadcast %196 : vector<2x8x1xf32> to vector<2x8x8xf32>
    %198 = arith.subf %194, %197 : vector<2x8x8xf32>
    %199 = math.exp %198 : vector<2x8x8xf32>
    %cst_81 = arith.constant dense<0.000000e+00> : vector<2x8xf32>
    %200 = vector.multi_reduction <add>, %199, %cst_81 [2] : vector<2x8x8xf32> to vector<2x8xf32>
    %201 = vector.shape_cast %200 : vector<2x8xf32> to vector<2x8x1xf32>
    %202 = vector.broadcast %201 : vector<2x8x1xf32> to vector<2x8x8xf32>
    %203 = arith.divf %199, %202 : vector<2x8x8xf32>
    "tpu.trace_start"() <{level = 10 : i32, message = "bqk,bkd->bqd"}> : () -> ()
    %cst_82 = arith.constant dense<0.000000e+00> : vector<2x8x8xf32>
    %204 = tpu.matmul %203, %189, %cst_82 {dimension_numbers = #tpu.dot_dimension_numbers<[2], [1], [1], [2], [0, 0, 0, 1, 1, 2], [0], [0]>} : vector<2x8x8xf32>, vector<2x8x8xf32>, vector<2x8x8xf32> -> vector<2x8x8xf32>
    "tpu.trace_stop"() : () -> ()
    %205 = vector.extract_strided_slice %183 {offsets = [0, 8], sizes = [16, 8], strides = [1, 1]} : vector<16x128xf32> to vector<16x8xf32>
    %206 = vector.shape_cast %205 : vector<16x8xf32> to vector<2x8x8xf32>
    %207 = vector.extract_strided_slice %183 {offsets = [0, 40], sizes = [16, 8], strides = [1, 1]} : vector<16x128xf32> to vector<16x8xf32>
    %208 = vector.shape_cast %207 : vector<16x8xf32> to vector<2x8x8xf32>
    %209 = vector.extract_strided_slice %183 {offsets = [0, 72], sizes = [16, 8], strides = [1, 1]} : vector<16x128xf32> to vector<16x8xf32>
    %210 = vector.shape_cast %209 : vector<16x8xf32> to vector<2x8x8xf32>
    "tpu.trace_start"() <{level = 10 : i32, message = "bqd,bkd->bqk"}> : () -> ()
    %cst_83 = arith.constant dense<0.000000e+00> : vector<2x8x8xf32>
    %211 = tpu.matmul %206, %208, %cst_83 {dimension_numbers = #tpu.dot_dimension_numbers<[2], [2], [1], [1], [0, 0, 0, 1, 1, 1], [0], [0]>} : vector<2x8x8xf32>, vector<2x8x8xf32>, vector<2x8x8xf32> -> vector<2x8x8xf32>
    %cst_84 = arith.constant -1.000000e+09 : f32
    "tpu.trace_stop"() : () -> ()
    %212 = vector.shape_cast %5 : vector<1x8x8xi1> to vector<1x8x8xi1>
    %213 = vector.broadcast %212 : vector<1x8x8xi1> to vector<2x8x8xi1>
    %214 = vector.broadcast %cst_84 : f32 to vector<2x8x8xf32>
    %215 = arith.select %213, %211, %214 : vector<2x8x8xi1>, vector<2x8x8xf32>
    %cst_85 = arith.constant dense<0xFF800000> : vector<2x8xf32>
    %216 = vector.multi_reduction <maximumf>, %215, %cst_85 [2] : vector<2x8x8xf32> to vector<2x8xf32>
    %217 = vector.shape_cast %216 : vector<2x8xf32> to vector<2x8x1xf32>
    %218 = vector.broadcast %217 : vector<2x8x1xf32> to vector<2x8x8xf32>
    %219 = arith.subf %215, %218 : vector<2x8x8xf32>
    %220 = math.exp %219 : vector<2x8x8xf32>
    %cst_86 = arith.constant dense<0.000000e+00> : vector<2x8xf32>
    %221 = vector.multi_reduction <add>, %220, %cst_86 [2] : vector<2x8x8xf32> to vector<2x8xf32>
    %222 = vector.shape_cast %221 : vector<2x8xf32> to vector<2x8x1xf32>
    %223 = vector.broadcast %222 : vector<2x8x1xf32> to vector<2x8x8xf32>
    %224 = arith.divf %220, %223 : vector<2x8x8xf32>
    "tpu.trace_start"() <{level = 10 : i32, message = "bqk,bkd->bqd"}> : () -> ()
    %cst_87 = arith.constant dense<0.000000e+00> : vector<2x8x8xf32>
    %225 = tpu.matmul %224, %210, %cst_87 {dimension_numbers = #tpu.dot_dimension_numbers<[2], [1], [1], [2], [0, 0, 0, 1, 1, 2], [0], [0]>} : vector<2x8x8xf32>, vector<2x8x8xf32>, vector<2x8x8xf32> -> vector<2x8x8xf32>
    "tpu.trace_stop"() : () -> ()
    %226 = vector.extract_strided_slice %183 {offsets = [0, 16], sizes = [16, 8], strides = [1, 1]} : vector<16x128xf32> to vector<16x8xf32>
    %227 = vector.shape_cast %226 : vector<16x8xf32> to vector<2x8x8xf32>
    %228 = vector.extract_strided_slice %183 {offsets = [0, 48], sizes = [16, 8], strides = [1, 1]} : vector<16x128xf32> to vector<16x8xf32>
    %229 = vector.shape_cast %228 : vector<16x8xf32> to vector<2x8x8xf32>
    %230 = vector.extract_strided_slice %183 {offsets = [0, 80], sizes = [16, 8], strides = [1, 1]} : vector<16x128xf32> to vector<16x8xf32>
    %231 = vector.shape_cast %230 : vector<16x8xf32> to vector<2x8x8xf32>
    "tpu.trace_start"() <{level = 10 : i32, message = "bqd,bkd->bqk"}> : () -> ()
    %cst_88 = arith.constant dense<0.000000e+00> : vector<2x8x8xf32>
    %232 = tpu.matmul %227, %229, %cst_88 {dimension_numbers = #tpu.dot_dimension_numbers<[2], [2], [1], [1], [0, 0, 0, 1, 1, 1], [0], [0]>} : vector<2x8x8xf32>, vector<2x8x8xf32>, vector<2x8x8xf32> -> vector<2x8x8xf32>
    %cst_89 = arith.constant -1.000000e+09 : f32
    "tpu.trace_stop"() : () -> ()
    %233 = vector.shape_cast %5 : vector<1x8x8xi1> to vector<1x8x8xi1>
    %234 = vector.broadcast %233 : vector<1x8x8xi1> to vector<2x8x8xi1>
    %235 = vector.broadcast %cst_89 : f32 to vector<2x8x8xf32>
    %236 = arith.select %234, %232, %235 : vector<2x8x8xi1>, vector<2x8x8xf32>
    %cst_90 = arith.constant dense<0xFF800000> : vector<2x8xf32>
    %237 = vector.multi_reduction <maximumf>, %236, %cst_90 [2] : vector<2x8x8xf32> to vector<2x8xf32>
    %238 = vector.shape_cast %237 : vector<2x8xf32> to vector<2x8x1xf32>
    %239 = vector.broadcast %238 : vector<2x8x1xf32> to vector<2x8x8xf32>
    %240 = arith.subf %236, %239 : vector<2x8x8xf32>
    %241 = math.exp %240 : vector<2x8x8xf32>
    %cst_91 = arith.constant dense<0.000000e+00> : vector<2x8xf32>
    %242 = vector.multi_reduction <add>, %241, %cst_91 [2] : vector<2x8x8xf32> to vector<2x8xf32>
    %243 = vector.shape_cast %242 : vector<2x8xf32> to vector<2x8x1xf32>
    %244 = vector.broadcast %243 : vector<2x8x1xf32> to vector<2x8x8xf32>
    %245 = arith.divf %241, %244 : vector<2x8x8xf32>
    "tpu.trace_start"() <{level = 10 : i32, message = "bqk,bkd->bqd"}> : () -> ()
    %cst_92 = arith.constant dense<0.000000e+00> : vector<2x8x8xf32>
    %246 = tpu.matmul %245, %231, %cst_92 {dimension_numbers = #tpu.dot_dimension_numbers<[2], [1], [1], [2], [0, 0, 0, 1, 1, 2], [0], [0]>} : vector<2x8x8xf32>, vector<2x8x8xf32>, vector<2x8x8xf32> -> vector<2x8x8xf32>
    "tpu.trace_stop"() : () -> ()
    %247 = vector.extract_strided_slice %183 {offsets = [0, 24], sizes = [16, 8], strides = [1, 1]} : vector<16x128xf32> to vector<16x8xf32>
    %248 = vector.shape_cast %247 : vector<16x8xf32> to vector<2x8x8xf32>
    %249 = vector.extract_strided_slice %183 {offsets = [0, 56], sizes = [16, 8], strides = [1, 1]} : vector<16x128xf32> to vector<16x8xf32>
    %250 = vector.shape_cast %249 : vector<16x8xf32> to vector<2x8x8xf32>
    %251 = vector.extract_strided_slice %183 {offsets = [0, 88], sizes = [16, 8], strides = [1, 1]} : vector<16x128xf32> to vector<16x8xf32>
    %252 = vector.shape_cast %251 : vector<16x8xf32> to vector<2x8x8xf32>
    "tpu.trace_start"() <{level = 10 : i32, message = "bqd,bkd->bqk"}> : () -> ()
    %cst_93 = arith.constant dense<0.000000e+00> : vector<2x8x8xf32>
    %253 = tpu.matmul %248, %250, %cst_93 {dimension_numbers = #tpu.dot_dimension_numbers<[2], [2], [1], [1], [0, 0, 0, 1, 1, 1], [0], [0]>} : vector<2x8x8xf32>, vector<2x8x8xf32>, vector<2x8x8xf32> -> vector<2x8x8xf32>
    %cst_94 = arith.constant -1.000000e+09 : f32
    "tpu.trace_stop"() : () -> ()
    %254 = vector.shape_cast %5 : vector<1x8x8xi1> to vector<1x8x8xi1>
    %255 = vector.broadcast %254 : vector<1x8x8xi1> to vector<2x8x8xi1>
    %256 = vector.broadcast %cst_94 : f32 to vector<2x8x8xf32>
    %257 = arith.select %255, %253, %256 : vector<2x8x8xi1>, vector<2x8x8xf32>
    %cst_95 = arith.constant dense<0xFF800000> : vector<2x8xf32>
    %258 = vector.multi_reduction <maximumf>, %257, %cst_95 [2] : vector<2x8x8xf32> to vector<2x8xf32>
    %259 = vector.shape_cast %258 : vector<2x8xf32> to vector<2x8x1xf32>
    %260 = vector.broadcast %259 : vector<2x8x1xf32> to vector<2x8x8xf32>
    %261 = arith.subf %257, %260 : vector<2x8x8xf32>
    %262 = math.exp %261 : vector<2x8x8xf32>
    %cst_96 = arith.constant dense<0.000000e+00> : vector<2x8xf32>
    %263 = vector.multi_reduction <add>, %262, %cst_96 [2] : vector<2x8x8xf32> to vector<2x8xf32>
    %264 = vector.shape_cast %263 : vector<2x8xf32> to vector<2x8x1xf32>
    %265 = vector.broadcast %264 : vector<2x8x1xf32> to vector<2x8x8xf32>
    %266 = arith.divf %262, %265 : vector<2x8x8xf32>
    "tpu.trace_start"() <{level = 10 : i32, message = "bqk,bkd->bqd"}> : () -> ()
    %cst_97 = arith.constant dense<0.000000e+00> : vector<2x8x8xf32>
    %267 = tpu.matmul %266, %252, %cst_97 {dimension_numbers = #tpu.dot_dimension_numbers<[2], [1], [1], [2], [0, 0, 0, 1, 1, 2], [0], [0]>} : vector<2x8x8xf32>, vector<2x8x8xf32>, vector<2x8x8xf32> -> vector<2x8x8xf32>
    "tpu.trace_stop"() : () -> ()
    %268 = tpu.concatenate %203, %224, %245, %266 in 2 : vector<2x8x8xf32>, vector<2x8x8xf32>, vector<2x8x8xf32>, vector<2x8x8xf32> -> vector<2x8x32xf32>
    %269 = tpu.concatenate %204, %225, %246, %267 in 2 : vector<2x8x8xf32>, vector<2x8x8xf32>, vector<2x8x8xf32>, vector<2x8x8xf32> -> vector<2x8x32xf32>
    %270 = vector.shape_cast %269 : vector<2x8x32xf32> to vector<16x32xf32>
    %c1_98 = arith.constant 1 : index
    %c0_99 = arith.constant 0 : index
    %c0_100 = arith.constant 0 : index
    %271 = vector.load %arg3[%c1_98, %c0_99, %c0_100] : memref<2x32x32xf32, #tpu.memory_space<vmem>>, vector<1x32x32xf32>
    %272 = vector.shape_cast %271 : vector<1x32x32xf32> to vector<32x32xf32>
    %cst_101 = arith.constant dense<0.000000e+00> : vector<16x32xf32>
    %273 = tpu.matmul %270, %272, %cst_101 {dimension_numbers = #tpu.dot_dimension_numbers<[1], [0], [0], [1], [0, 0, 1, 1], [], []>} : vector<16x32xf32>, vector<32x32xf32>, vector<16x32xf32> -> vector<16x32xf32>
    %c1_102 = arith.constant 1 : index
    %c0_103 = arith.constant 0 : index
    %c0_104 = arith.constant 0 : index
    %274 = vector.load %arg4[%c1_102, %c0_103, %c0_104] : memref<2x1x32xf32, #tpu.memory_space<vmem>>, vector<1x1x32xf32>
    %275 = vector.shape_cast %274 : vector<1x1x32xf32> to vector<1x32xf32>
    %276 = vector.broadcast %275 : vector<1x32xf32> to vector<16x32xf32>
    %277 = arith.addf %273, %276 : vector<16x32xf32>
    %278 = arith.addf %176, %277 : vector<16x32xf32>
    %c1_105 = arith.constant 1 : index
    %c0_106 = arith.constant 0 : index
    %c0_107 = arith.constant 0 : index
    %279 = vector.load %arg5[%c1_105, %c0_106, %c0_107] : memref<2x1x32xf32, #tpu.memory_space<vmem>>, vector<1x1x32xf32>
    %280 = vector.shape_cast %279 : vector<1x1x32xf32> to vector<1x32xf32>
    %c1_108 = arith.constant 1 : index
    %c0_109 = arith.constant 0 : index
    %c0_110 = arith.constant 0 : index
    %281 = vector.load %arg6[%c1_108, %c0_109, %c0_110] : memref<2x1x32xf32, #tpu.memory_space<vmem>>, vector<1x1x32xf32>
    %282 = vector.shape_cast %281 : vector<1x1x32xf32> to vector<1x32xf32>
    %cst_111 = arith.constant dense<0.000000e+00> : vector<16xf32>
    %283 = vector.multi_reduction <add>, %278, %cst_111 [1] : vector<16x32xf32> to vector<16xf32>
    %284 = vector.shape_cast %283 : vector<16xf32> to vector<16x1xf32>
    %cst_112 = arith.constant 3.200000e+01 : f32
    %285 = vector.broadcast %cst_112 : f32 to vector<16x1xf32>
    %286 = arith.divf %284, %285 : vector<16x1xf32>
    %287 = vector.broadcast %286 : vector<16x1xf32> to vector<16x32xf32>
    %288 = arith.subf %278, %287 : vector<16x32xf32>
    %289 = arith.mulf %288, %288 : vector<16x32xf32>
    %cst_113 = arith.constant dense<0.000000e+00> : vector<16xf32>
    %290 = vector.multi_reduction <add>, %289, %cst_113 [1] : vector<16x32xf32> to vector<16xf32>
    %291 = vector.shape_cast %290 : vector<16xf32> to vector<16x1xf32>
    %cst_114 = arith.constant 3.200000e+01 : f32
    %292 = vector.broadcast %cst_114 : f32 to vector<16x1xf32>
    %293 = arith.divf %291, %292 : vector<16x1xf32>
    %294 = vector.broadcast %286 : vector<16x1xf32> to vector<16x32xf32>
    %295 = arith.subf %278, %294 : vector<16x32xf32>
    %cst_115 = arith.constant 9.99999974E-6 : f32
    %296 = vector.broadcast %cst_115 : f32 to vector<16x1xf32>
    %297 = arith.addf %293, %296 : vector<16x1xf32>
    %298 = math.rsqrt %297 : vector<16x1xf32>
    %299 = vector.broadcast %298 : vector<16x1xf32> to vector<16x32xf32>
    %300 = arith.mulf %295, %299 : vector<16x32xf32>
    %301 = vector.broadcast %280 : vector<1x32xf32> to vector<16x32xf32>
    %302 = arith.mulf %300, %301 : vector<16x32xf32>
    %303 = vector.broadcast %282 : vector<1x32xf32> to vector<16x32xf32>
    %304 = arith.addf %302, %303 : vector<16x32xf32>
    %c1_116 = arith.constant 1 : index
    %c0_117 = arith.constant 0 : index
    %c0_118 = arith.constant 0 : index
    %305 = vector.load %arg7[%c1_116, %c0_117, %c0_118] : memref<2x32x128xf32, #tpu.memory_space<vmem>>, vector<1x32x128xf32>
    %306 = vector.shape_cast %305 : vector<1x32x128xf32> to vector<32x128xf32>
    %cst_119 = arith.constant dense<0.000000e+00> : vector<16x128xf32>
    %307 = tpu.matmul %304, %306, %cst_119 {dimension_numbers = #tpu.dot_dimension_numbers<[1], [0], [0], [1], [0, 0, 1, 1], [], []>} : vector<16x32xf32>, vector<32x128xf32>, vector<16x128xf32> -> vector<16x128xf32>
    %c1_120 = arith.constant 1 : index
    %c0_121 = arith.constant 0 : index
    %c0_122 = arith.constant 0 : index
    %308 = vector.load %arg8[%c1_120, %c0_121, %c0_122] : memref<2x1x128xf32, #tpu.memory_space<vmem>>, vector<1x1x128xf32>
    %309 = vector.shape_cast %308 : vector<1x1x128xf32> to vector<1x128xf32>
    %310 = vector.broadcast %309 : vector<1x128xf32> to vector<16x128xf32>
    %311 = arith.addf %307, %310 : vector<16x128xf32>
    %cst_123 = arith.constant 0.000000e+00 : f32
    %312 = vector.broadcast %cst_123 : f32 to vector<16x128xf32>
    %313 = arith.maximumf %311, %312 : vector<16x128xf32>
    %c1_124 = arith.constant 1 : index
    %c0_125 = arith.constant 0 : index
    %c0_126 = arith.constant 0 : index
    %314 = vector.load %arg9[%c1_124, %c0_125, %c0_126] : memref<2x128x32xf32, #tpu.memory_space<vmem>>, vector<1x128x32xf32>
    %315 = vector.shape_cast %314 : vector<1x128x32xf32> to vector<128x32xf32>
    %cst_127 = arith.constant dense<0.000000e+00> : vector<16x32xf32>
    %316 = tpu.matmul %313, %315, %cst_127 {dimension_numbers = #tpu.dot_dimension_numbers<[1], [0], [0], [1], [0, 0, 1, 1], [], []>} : vector<16x128xf32>, vector<128x32xf32>, vector<16x32xf32> -> vector<16x32xf32>
    %c1_128 = arith.constant 1 : index
    %c0_129 = arith.constant 0 : index
    %c0_130 = arith.constant 0 : index
    %317 = vector.load %arg10[%c1_128, %c0_129, %c0_130] : memref<2x1x32xf32, #tpu.memory_space<vmem>>, vector<1x1x32xf32>
    %318 = vector.shape_cast %317 : vector<1x1x32xf32> to vector<1x32xf32>
    %319 = vector.broadcast %318 : vector<1x32xf32> to vector<16x32xf32>
    %320 = arith.addf %316, %319 : vector<16x32xf32>
    %321 = arith.addf %304, %320 : vector<16x32xf32>
    %c1_131 = arith.constant 1 : index
    %c0_132 = arith.constant 0 : index
    %c0_133 = arith.constant 0 : index
    %322 = vector.load %arg11[%c1_131, %c0_132, %c0_133] : memref<2x1x32xf32, #tpu.memory_space<vmem>>, vector<1x1x32xf32>
    %323 = vector.shape_cast %322 : vector<1x1x32xf32> to vector<1x32xf32>
    %c1_134 = arith.constant 1 : index
    %c0_135 = arith.constant 0 : index
    %c0_136 = arith.constant 0 : index
    %324 = vector.load %arg12[%c1_134, %c0_135, %c0_136] : memref<2x1x32xf32, #tpu.memory_space<vmem>>, vector<1x1x32xf32>
    %325 = vector.shape_cast %324 : vector<1x1x32xf32> to vector<1x32xf32>
    %cst_137 = arith.constant dense<0.000000e+00> : vector<16xf32>
    %326 = vector.multi_reduction <add>, %321, %cst_137 [1] : vector<16x32xf32> to vector<16xf32>
    %327 = vector.shape_cast %326 : vector<16xf32> to vector<16x1xf32>
    %cst_138 = arith.constant 3.200000e+01 : f32
    %328 = vector.broadcast %cst_138 : f32 to vector<16x1xf32>
    %329 = arith.divf %327, %328 : vector<16x1xf32>
    %330 = vector.broadcast %329 : vector<16x1xf32> to vector<16x32xf32>
    %331 = arith.subf %321, %330 : vector<16x32xf32>
    %332 = arith.mulf %331, %331 : vector<16x32xf32>
    %cst_139 = arith.constant dense<0.000000e+00> : vector<16xf32>
    %333 = vector.multi_reduction <add>, %332, %cst_139 [1] : vector<16x32xf32> to vector<16xf32>
    %334 = vector.shape_cast %333 : vector<16xf32> to vector<16x1xf32>
    %cst_140 = arith.constant 3.200000e+01 : f32
    %335 = vector.broadcast %cst_140 : f32 to vector<16x1xf32>
    %336 = arith.divf %334, %335 : vector<16x1xf32>
    %337 = vector.broadcast %329 : vector<16x1xf32> to vector<16x32xf32>
    %338 = arith.subf %321, %337 : vector<16x32xf32>
    %cst_141 = arith.constant 9.99999974E-6 : f32
    %339 = vector.broadcast %cst_141 : f32 to vector<16x1xf32>
    %340 = arith.addf %336, %339 : vector<16x1xf32>
    %341 = math.rsqrt %340 : vector<16x1xf32>
    %342 = vector.broadcast %341 : vector<16x1xf32> to vector<16x32xf32>
    %343 = arith.mulf %338, %342 : vector<16x32xf32>
    %344 = vector.broadcast %323 : vector<1x32xf32> to vector<16x32xf32>
    %345 = arith.mulf %343, %344 : vector<16x32xf32>
    %346 = vector.broadcast %325 : vector<1x32xf32> to vector<16x32xf32>
    %347 = arith.addf %345, %346 : vector<16x32xf32>
    %c0_142 = arith.constant 0 : index
    %c0_143 = arith.constant 0 : index
    %348 = vector.load %arg13[%c0_142, %c0_143] : memref<32x128xf32, #tpu.memory_space<vmem>>, vector<32x128xf32>
    %cst_144 = arith.constant dense<0.000000e+00> : vector<16x128xf32>
    %349 = tpu.matmul %347, %348, %cst_144 {dimension_numbers = #tpu.dot_dimension_numbers<[1], [0], [0], [1], [0, 0, 1, 1], [], []>} : vector<16x32xf32>, vector<32x128xf32>, vector<16x128xf32> -> vector<16x128xf32>
    %c0_145 = arith.constant 0 : index
    %c0_146 = arith.constant 0 : index
    %350 = vector.load %arg14[%c0_145, %c0_146] : memref<1x128xf32, #tpu.memory_space<vmem>>, vector<1x128xf32>
    %351 = vector.broadcast %350 : vector<1x128xf32> to vector<16x128xf32>
    %352 = arith.addf %349, %351 : vector<16x128xf32>
    %353 = vector.shape_cast %352 : vector<16x128xf32> to vector<2x8x128xf32>
    %c0_147 = arith.constant 0 : index
    %c0_148 = arith.constant 0 : index
    %c0_149 = arith.constant 0 : index
    %354 = vector.load %arg15[%c0_147, %c0_148, %c0_149] : memref<2x8x128xf32, #tpu.memory_space<vmem>>, vector<2x8x128xf32>
    tpu.vector_store %arg15[%c0_147, %c0_148, %c0_149], %353 {strides = array<i32>} : memref<2x8x128xf32, #tpu.memory_space<vmem>>, vector<2x8x128xf32>,
    %355 = tpu.concatenate %97, %268 in 2 : vector<2x8x32xf32>, vector<2x8x32xf32> -> vector<2x8x64xf32>
    %cst_150 = arith.constant 0.000000e+00 : f32
    %356 = vector.broadcast %cst_150 : f32 to vector<2x8x64xf32>
    %357 = tpu.concatenate %355, %356 in 2 : vector<2x8x64xf32>, vector<2x8x64xf32> -> vector<2x8x128xf32>
    %c0_151 = arith.constant 0 : index
    %c0_152 = arith.constant 0 : index
    %c0_153 = arith.constant 0 : index
    %358 = vector.load %arg16[%c0_151, %c0_152, %c0_153] : memref<2x8x128xf32, #tpu.memory_space<vmem>>, vector<2x8x128xf32>
    tpu.vector_store %arg16[%c0_151, %c0_152, %c0_153], %357 {strides = array<i32>} : memref<2x8x128xf32, #tpu.memory_space<vmem>>, vector<2x8x128xf32>,
    return
  }
}

</mosaic_0001>

<bundles_post_ra>
// kernel: tpu_custom_call.1
= control target key start
LH: loop header
LB: loop body
LE: loop exit
PB: predicated region body
PF: predicated region fallthrough
CT: control target
= control target key end

     0   :  { %s5623_s0 = inlined_call_operand.vmem [shape: f32[2,8,32], index: 0, kind: input, shape index: {}]   ;;  %s5624_s1 = inlined_call_operand.vmem [shape: f32[2,32,128], index: 1, kind: input, shape index: {}]   ;;  %s5625_s2 = inlined_call_operand.vmem [shape: f32[2,1,128], index: 2, kind: input, shape index: {}]   ;;  %s5626_s3 = inlined_call_operand.vmem [shape: f32[2,32,32], index: 3, kind: input, shape index: {}]   ;;  %s5627_s4 = inlined_call_operand.vmem [shape: f32[2,1,32], index: 4, kind: input, shape index: {}]   ;;  %s5628_s5 = inlined_call_operand.vmem [shape: f32[2,1,32], index: 5, kind: input, shape index: {}]   ;;  %s5629_s6 = inlined_call_operand.vmem [shape: f32[2,1,32], index: 6, kind: input, shape index: {}]   ;;  %s5630_s7 = inlined_call_operand.vmem [shape: f32[2,32,128], index: 7, kind: input, shape index: {}]   ;;  %s5631_s8 = inlined_call_operand.vmem [shape: f32[2,1,128], index: 8, kind: input, shape index: {}]   ;;  %s5632_s9 = inlined_call_operand.vmem [shape: f32[2,128,32], index: 9, kind: input, shape index: {}]   ;;  %s5633_s10 = inlined_call_operand.vmem [shape: f32[2,1,32], index: 10, kind: input, shape index: {}]   ;;  %s5634_s11 = inlined_call_operand.vmem [shape: f32[2,1,32], index: 11, kind: input, shape index: {}]   ;;  %s5635_s12 = inlined_call_operand.vmem [shape: f32[2,1,32], index: 12, kind: input, shape index: {}]   ;;  %s5636_s13 = inlined_call_operand.vmem [shape: f32[32,128], index: 13, kind: input, shape index: {}]   ;;  %s5637_s14 = inlined_call_operand.vmem [shape: f32[1,128], index: 14, kind: input, shape index: {}]   ;;  %s5638_s15 = inlined_call_operand.hbm [shape: f32[2,8,128], index: 15, kind: output, shape index: {0}]   ;;  %s5639_s16 = inlined_call_operand.hbm [shape: f32[2,8,128], index: 16, kind: output, shape index: {1}]  }
   0x1   :  { %5659 = sst [smem:[#allocation8_spill]] %s5623_s0 }
   0x2   :  { %22 = vsyncpa [#allocation3], 0  ;;  %v61_v0 = vld [vmem:[%s5624_s1] sm:$0xff]  ;;  %v62_v1 = vld [vmem:[%s5624_s1 + $0x8] sm:$0xff]  ;;  %vm72_vm0 = vcmask 261120   ;;  %s5660_s0 = sld [smem:[#allocation8_spill]] }
   0x3   :  { %v63_v2 = vld [vmem:[%s5624_s1 + $0x10] sm:$0xff]  ;;  %v4481_v3 = vpack.c.bf16 %v62_v1, %v61_v0  ;;  %v64_v4 = vld [vmem:[%s5624_s1 + $0x18] sm:$0xff] }
   0x4   :  { %v4485_v6 = vpack.c.bf16 %v64_v4, %v63_v2 }
   0x8   :  { %v4869_v5 = vld [vmem:[%s5660_s0] sm:$0xff] }
   0x9   :  { %4182 = vmatprep.mubr.msk.f32.mxu1 %vm72_vm0, %v4869_v5 }
   0xa   :  { %23 = vsyncpa [#allocation5], 0  ;;  %4482 = vmatprep.subr.bf16.mxu1 %v4481_v3  ;;  %v4876_v7 = vld [vmem:[%s5660_s0 + $0x8] sm:$0xff]  ;;  %v4749_v8 = vmov 0.0   ;;  %vm4750_vm1 = vmmov 0   ;;  %s4751_s21 = smov 96   ;;  %v56_v16 = vlaneseq }
   0xb   :  { %4484 = vmatpush3.bf16.msra.mxu1 %v4481_v3  ;;  %4205 = vmatprep.subr.mxu0 %v4749_v8  ;;  %v3917_v9 = vld [vmem:[%s5625_s2] ss:$0 sm:$0xff]  ;;  %vm157_vm2 = vcmask 64512   ;;  %s4752_s22 = smov 64   ;;  %s4753_s23 = smov 88   ;;  %vm1506_vm4 = vcmask 195584  }
   0xc   :  { %4486 = vmatprep.subr.bf16.mxu1 %v4485_v6  ;;  %4207 = vmatprep.mubr.msk.f32.mxu0 %vm4750_vm1, %v4749_v8  ;;  %v57_v17 = vshrl.u32 %v56_v16, 7  ;;  %v59_v18 = vand.u32 127, %v56_v16  ;;  %s4754_s24 = smov 120   ;;  %s4755_s25 = smov 56   ;;  %vm1503_vm5 = vcmask 130048   ;;  %vm3880_vm6 = vcmask 523264  }
   0xd   :  { %s5655_s26 = smov 112   ;;  %s5657_s27 = smov 80  }
   0xe   :  { %vm4909_vm3 = vcmp.le.s32.totalorder %v59_v18, %v57_v17  ;;  %s5651_s28 = smov 48   ;;  %s5649_s29 = smov 72  }
   0xf   :  { %4488 = vmatpush3.bf16.msra.mxu1 %v4485_v6  ;;  %s5647_s30 = smov 104   ;;  %s5645_s0 = smov 40  }
  0x10   :  { %4185 = vmatprep.subr.mxu1 %v4749_v8  ;;  %s5643_s17 = smov 8   ;;  %s5641_s18 = smov 16  }
  0x11   :  { %s5653_s19 = smov 24  }
  0x12   :  { %4183 = vmatmul.mubr.msk.f32.vlgmr.msra.gmra.mrb[0].mxu1 %vm72_vm0, %v4876_v7 }
  0x13   :  { %4187 = vmatprep.mubr.msk.f32.mxu1 %vm4750_vm1, %v4749_v8 }
  0xe5   :  { %v4184_v10 = vpop.f32.mrb[0].mxu1 }
  0xe6   :  { %v145_v11 = vpop.f32.mrb[1].mxu1  ;;  %v4893_v13 = vadd.f32 %v4184_v10, %v3917_v9 }
  0xe7   :  { %v4889_v12 = vadd.f32 %v3917_v9, %v145_v11 }
  0xe9   :  { %155 = vrot.lane.b32.xlu0 %v4889_v12, %s4751_s21 }
  0xed   :  { %233 = vrot.lane.b32.xlu0 %v4893_v13, %s4751_s21 }
 0x15b   :  { %v156_v14 = vpop.permute.xlu0 %155 }
 0x15c   :  { %4186 = vmatpush3.xpose.msk.msra.mxu1 %vm157_vm2, %v156_v14 }
 0x15d   :  { %4190 = vmatprep.subr.mxu1 %v4749_v8 }
 0x15f   :  { %4188 = vmatmul.mubr.msk.f32.vlgmr.msra.gmra.mrb[2].mxu1 %vm157_vm2, %v4889_v12  ;;  %v234_v15 = vpop.permute.xlu0 %233 }
 0x160   :  { %4191 = vmatpush3.xpose.msk.msra.mxu1 %vm157_vm2, %v234_v15  ;;  %4192 = vmatprep.mubr.msk.f32.mxu1 %vm4750_vm1, %v4749_v8 }
 0x161   :  { %4195 = vmatprep.subr.mxu1 %v4749_v8 }
 0x163   :  { %4193 = vmatmul.mubr.msk.f32.vlgmr.msra.gmra.mrb[4].mxu1 %vm157_vm2, %v4893_v13 }
 0x164   :  { %4197 = vmatprep.mubr.msk.f32.mxu1 %vm4750_vm1, %v4749_v8 }
 0x232   :  { %v228_v20 = vpop.f32.mrb[2].mxu1 }
 0x233   :  { %v311_v21 = vsel %vm4909_vm3, %v228_v20, -1e+09  ;;  %v4189_v22 = vpop.f32.mrb[3].mxu1 }
 0x234   :  { %v313_v23 = vsel %vm157_vm2, %v311_v21, -inf }
 0x235   :  { %314 = vmax.xlane.f32.xlu1 %v313_v23 }
 0x236   :  { %v305_v24 = vpop.f32.mrb[4].mxu1 }
 0x237   :  { %v312_v25 = vsel %vm4909_vm3, %v305_v24, -1e+09  ;;  %v4194_v26 = vpop.f32.mrb[5].mxu1 }
 0x238   :  { %v316_v27 = vsel %vm157_vm2, %v312_v25, -inf }
 0x239   :  { %317 = vmax.xlane.f32.xlu1 %v316_v27 }
 0x24a   :  { %335 = vrot.lane.b32.xlu1 %v4889_v12, %s4752_s22 }
 0x24e   :  { %411 = vrot.lane.b32.xlu1 %v4893_v13, %s4752_s22 }
 0x252   :  { %489 = vrot.lane.b32.xlu1 %v4889_v12, %s4753_s23 }
 0x256   :  { %567 = vrot.lane.b32.xlu1 %v4893_v13, %s4753_s23 }
 0x2c2   :  { %v315_v28 = vpop.xlane.xlu1 %314 }
 0x2c3   :  { %v319_v29 = vsub.f32 %v311_v21, %v315_v28 }
 0x2c5   :  { %v321_v30 = vmul.f32 1.442695, %v319_v29 }
 0x2c6   :  { %v318_v31 = vpop.xlane.xlu1 %317 }
 0x2c7   :  { %4621 = vpow2.f32 %v321_v30  ;;  %v320_v32 = vsub.f32 %v312_v25, %v318_v31 }
 0x2c9   :  { %v323_v33 = vmul.f32 1.442695, %v320_v32 }
 0x2ca   :  { %v336_v34 = vpop.permute.xlu1 %335 }
 0x2cb   :  { %4623 = vpow2.f32 %v323_v33  ;;  %4196 = vmatpush3.msra.mxu1 %v336_v34 }
 0x2cc   :  { %4200 = vmatprep.subr.mxu1 %v4749_v8 }
 0x2ce   :  { %v412_v35 = vpop.permute.xlu1 %411 }
 0x2d1   :  { %v4622_v36 = vpop.eup %4621 }
 0x2d2   :  { %v490_v37 = vpop.permute.xlu1 %489  ;;  %v325_v38 = vsel %vm157_vm2, %v4622_v36, 0.0 }
 0x2d3   :  { %326 = vadd.xlane.f32.xlu0 %v325_v38  ;;  %4206 = vmatpush3.xpose.msk.msra.mxu0 %vm157_vm2, %v490_v37 }
 0x2d4   :  { %4215 = vmatprep.subr.mxu0 %v4749_v8 }
 0x2d5   :  { %v4624_v39 = vpop.eup %4623 }
 0x2d6   :  { %v328_v40 = vsel %vm157_vm2, %v4624_v39, 0.0  ;;  %v568_v41 = vpop.permute.xlu1 %567 }
 0x2d7   :  { %329 = vadd.xlane.f32.xlu1 %v328_v40 }
 0x2e8   :  { %565 = vrot.lane.b32.xlu1 %v4893_v13, %s4754_s24 }
 0x2e9   :  { %487 = vrot.lane.b32.xlu0 %v4889_v12, %s4754_s24 }
 0x360   :  { %v327_v42 = vpop.xlane.xlu0 %326 }
 0x361   :  { %4625 = vrcp.f32 %v327_v42 }
 0x364   :  { %v330_v43 = vpop.xlane.xlu1 %329  ;;  %v488_v44 = vpop.permute.xlu0 %487 }
 0x365   :  { %4627 = vrcp.f32 %v330_v43  ;;  %4208 = vmatmul.mubr.msk.f32.vlgmr.msra.gmra.mrb[0].mxu0 %vm157_vm2, %v488_v44 }
 0x366   :  { %4217 = vmatprep.mubr.msk.f32.mxu0 %vm4750_vm1, %v4749_v8 }
 0x368   :  { %v566_v49 = vpop.permute.xlu1 %565 }
 0x36b   :  { %v4626_v45 = vpop.eup %4625 }
 0x36c   :  { %v4939_v46 = vmul.f32 %v4626_v45, %v4622_v36 }
 0x36e   :  { %4198 = vmatmul.mubr.msk.f32.vlgmr.msra.gmra.mrb[6].mxu1 %vm157_vm2, %v4939_v46 }
 0x36f   :  { %v4628_v47 = vpop.eup %4627  ;;  %4201 = vmatpush3.msra.mxu1 %v412_v35  ;;  %4202 = vmatprep.mubr.msk.f32.mxu1 %vm4750_vm1, %v4749_v8 }
 0x370   :  { %v4945_v48 = vmul.f32 %v4628_v47, %v4624_v39  ;;  %4210 = vmatprep.subr.mxu1 %v4749_v8 }
 0x372   :  { %4203 = vmatmul.mubr.msk.f32.vlgmr.msra.gmra.mrb[8].mxu1 %vm157_vm2, %v4945_v48 }
 0x373   :  { %4212 = vmatprep.mubr.msk.f32.mxu1 %vm4750_vm1, %v4749_v8 }
 0x376   :  { %4211 = vmatpush3.xpose.msk.msra.mxu1 %vm157_vm2, %v568_v41 }
 0x377   :  { %4220 = vmatprep.subr.mxu1 %v4749_v8 }
 0x379   :  { %4213 = vmatmul.mubr.msk.f32.vlgmr.msra.gmra.mrb[10].mxu1 %vm157_vm2, %v566_v49 }
 0x37a   :  { %4222 = vmatprep.mubr.msk.f32.mxu1 %vm4750_vm1, %v4749_v8 }
 0x438   :  { %v561_v50 = vpop.f32.mrb[0].mxu0 }
 0x439   :  { %v643_v51 = vsel %vm4909_vm3, %v561_v50, -1e+09  ;;  %v4209_v52 = vpop.f32.mrb[1].mxu0 }
 0x43a   :  { %v645_v53 = vsel %vm157_vm2, %v643_v51, -inf }
 0x43b   :  { %646 = vmax.xlane.f32.xlu1 %v645_v53 }
 0x441   :  { %v4960_v54 = vpop.f32.mrb[6].mxu1 }
 0x442   :  { %v4199_v55 = vpop.f32.mrb[7].mxu1 }
 0x445   :  { %v4962_v56 = vpop.f32.mrb[8].mxu1 }
 0x446   :  { %v4204_v57 = vpop.f32.mrb[9].mxu1 }
 0x44c   :  { %v639_v58 = vpop.f32.mrb[10].mxu1 }
 0x44d   :  { %v644_v59 = vsel %vm4909_vm3, %v639_v58, -1e+09  ;;  %v4214_v60 = vpop.f32.mrb[11].mxu1 }
 0x44e   :  { %v648_v61 = vsel %vm157_vm2, %v644_v59, -inf }
 0x44f   :  { %649 = vmax.xlane.f32.xlu0 %v648_v61 }
 0x465   :  { %743 = vrot.lane.b32.xlu0 %v4893_v13, %s4755_s25 }
 0x469   :  { %819 = vrot.lane.b32.xlu0 %v4889_v12, %s5655_s26 }
 0x4c8   :  { %v647_v62 = vpop.xlane.xlu1 %646 }
 0x4c9   :  { %v651_v63 = vsub.f32 %v643_v51, %v647_v62 }
 0x4cb   :  { %v653_v0 = vmul.f32 1.442695, %v651_v63 }
 0x4cd   :  { %4629 = vpow2.f32 %v653_v0 }
 0x4d7   :  { %v4630_v1 = vpop.eup %4629 }
 0x4d8   :  { %v657_v2 = vsel %vm157_vm2, %v4630_v1, 0.0 }
 0x4d9   :  { %658 = vadd.xlane.f32.xlu1 %v657_v2 }
 0x4dc   :  { %v650_v3 = vpop.xlane.xlu0 %649 }
 0x4dd   :  { %v652_v6 = vsub.f32 %v644_v59, %v650_v3 }
 0x4df   :  { %v655_v9 = vmul.f32 1.442695, %v652_v6 }
 0x4e0   :  { %v744_v4 = vpop.permute.xlu0 %743 }
 0x4e1   :  { %4221 = vmatpush3.msra.mxu1 %v744_v4  ;;  %4631 = vpow2.f32 %v655_v9 }
 0x4e2   :  { %4230 = vmatprep.subr.mxu1 %v4749_v8 }
 0x4e4   :  { %v820_v20 = vpop.permute.xlu0 %819 }
 0x4ea   :  { %667 = vrot.lane.b32.xlu1 %v4889_v12, %s4755_s25 }
 0x4eb   :  { %v4632_v10 = vpop.eup %4631 }
 0x4ec   :  { %v660_v11 = vsel %vm157_vm2, %v4632_v10, 0.0 }
 0x4ee   :  { %821 = vrot.lane.b32.xlu1 %v4889_v12, %s5657_s27 }
 0x4f2   :  { %899 = vrot.lane.b32.xlu1 %v4893_v13, %s5657_s27  ;;  %s5669_s27 = smov 8  }
 0x516   :  { %661 = vadd.xlane.f32.xlu1 %v660_v11 }
 0x527   :  { %897 = vrot.lane.b32.xlu1 %v4893_v13, %s5655_s26  ;;  %s5671_s26 = smov 24  }
 0x566   :  { %v659_v14 = vpop.xlane.xlu1 %658 }
 0x567   :  { %4633 = vrcp.f32 %v659_v14 }
 0x56a   :  { %v668_v15 = vpop.permute.xlu1 %667 }
 0x56b   :  { %4216 = vmatpush3.msra.mxu0 %v668_v15 }
 0x56c   :  { %4225 = vmatprep.subr.mxu0 %v4749_v8 }
 0x56e   :  { %v822_v18 = vpop.permute.xlu1 %821 }
 0x571   :  { %v4634_v16 = vpop.eup %4633 }
 0x572   :  { %v4983_v17 = vmul.f32 %v4634_v16, %v4630_v1  ;;  %v900_v21 = vpop.permute.xlu1 %899 }
 0x574   :  { %4218 = vmatmul.mubr.msk.f32.vlgmr.msra.gmra.mrb[2].mxu0 %vm157_vm2, %v4983_v17 }
 0x575   :  { %4226 = vmatpush3.xpose.msk.msra.mxu0 %vm157_vm2, %v822_v18  ;;  %4227 = vmatprep.mubr.msk.f32.mxu0 %vm4750_vm1, %v4749_v8 }
 0x576   :  { %4235 = vmatprep.subr.mxu0 %v4749_v8 }
 0x578   :  { %4228 = vmatmul.mubr.msk.f32.vlgmr.msra.gmra.mrb[4].mxu0 %vm157_vm2, %v820_v20 }
 0x579   :  { %4237 = vmatprep.mubr.msk.f32.mxu0 %vm4750_vm1, %v4749_v8 }
 0x5a3   :  { %v662_v22 = vpop.xlane.xlu1 %661 }
 0x5a4   :  { %4635 = vrcp.f32 %v662_v22 }
 0x5a7   :  { %v898_v25 = vpop.permute.xlu1 %897 }
 0x5ae   :  { %v4636_v23 = vpop.eup %4635 }
 0x5af   :  { %v4994_v24 = vmul.f32 %v4636_v23, %v4632_v10 }
 0x5b1   :  { %4223 = vmatmul.mubr.msk.f32.vlgmr.msra.gmra.mrb[12].mxu1 %vm157_vm2, %v4994_v24 }
 0x5b2   :  { %4231 = vmatpush3.xpose.msk.msra.mxu1 %vm157_vm2, %v900_v21  ;;  %4232 = vmatprep.mubr.msk.f32.mxu1 %vm4750_vm1, %v4749_v8 }
 0x5b3   :  { %4240 = vmatprep.subr.mxu1 %v4749_v8 }
 0x5b5   :  { %4233 = vmatmul.mubr.msk.f32.vlgmr.msra.gmra.mrb[14].mxu1 %vm157_vm2, %v898_v25 }
 0x5b6   :  { %4242 = vmatprep.mubr.msk.f32.mxu1 %vm4750_vm1, %v4749_v8 }
 0x647   :  { %v5005_v26 = vpop.f32.mrb[2].mxu0 }
 0x648   :  { %v4219_v27 = vpop.f32.mrb[3].mxu0 }
 0x64b   :  { %v893_v28 = vpop.f32.mrb[4].mxu0 }
 0x64c   :  { %v975_v29 = vsel %vm4909_vm3, %v893_v28, -1e+09  ;;  %v4229_v30 = vpop.f32.mrb[5].mxu0 }
 0x64d   :  { %v977_v31 = vsel %vm157_vm2, %v975_v29, -inf }
 0x64e   :  { %978 = vmax.xlane.f32.xlu0 %v977_v31 }
 0x684   :  { %v5010_v32 = vpop.f32.mrb[12].mxu1 }
 0x685   :  { %v4224_v33 = vpop.f32.mrb[13].mxu1 }
 0x688   :  { %v971_v34 = vpop.f32.mrb[14].mxu1 }
 0x689   :  { %v976_v35 = vsel %vm4909_vm3, %v971_v34, -1e+09  ;;  %v4234_v36 = vpop.f32.mrb[15].mxu1 }
 0x68a   :  { %v980_v37 = vsel %vm157_vm2, %v976_v35, -inf }
 0x68b   :  { %981 = vmax.xlane.f32.xlu1 %v980_v37  ;;  %v1540_v37 = vld [vmem:[%s5626_s3 + $0x8] sm:$0xff] }
 0x69c   :  { %999 = vrot.lane.b32.xlu1 %v4889_v12, %s5651_s28 }
 0x6a0   :  { %1153 = vrot.lane.b32.xlu1 %v4889_v12, %s5649_s29 }
 0x6a4   :  { %1231 = vrot.lane.b32.xlu1 %v4893_v13, %s5649_s29 }
 0x6a8   :  { %1229 = vrot.lane.b32.xlu1 %v4893_v13, %s5647_s30 }
 0x6db   :  { %v979_v38 = vpop.xlane.xlu0 %978 }
 0x6dc   :  { %v983_v39 = vsub.f32 %v975_v29, %v979_v38  ;;  %v1541_v38 = vld [vmem:[%s5626_s3 + $0x10] sm:$0xff] }
 0x6de   :  { %v985_v40 = vmul.f32 1.442695, %v983_v39 }
 0x6e0   :  { %4637 = vpow2.f32 %v985_v40  ;;  %v1542_v40 = vld [vmem:[%s5626_s3 + $0x18] sm:$0xff] }
 0x6ea   :  { %v4638_v41 = vpop.eup %4637 }
 0x6eb   :  { %v989_v42 = vsel %vm157_vm2, %v4638_v41, 0.0 }
 0x6ec   :  { %990 = vadd.xlane.f32.xlu0 %v989_v42 }
 0x702   :  { %1075 = vrot.lane.b32.xlu0 %v4893_v13, %s5651_s28 }
 0x718   :  { %v982_v43 = vpop.xlane.xlu1 %981 }
 0x719   :  { %v984_v44 = vsub.f32 %v976_v35, %v982_v43 }
 0x71b   :  { %v987_v45 = vmul.f32 1.442695, %v984_v44 }
 0x71c   :  { %v1000_v47 = vpop.permute.xlu1 %999 }
 0x71d   :  { %4639 = vpow2.f32 %v987_v45  ;;  %4236 = vmatpush3.msra.mxu0 %v1000_v47 }
 0x71e   :  { %4245 = vmatprep.subr.mxu0 %v4749_v8 }
 0x720   :  { %v1154_v57 = vpop.permute.xlu1 %1153 }
 0x724   :  { %v1232_v61 = vpop.permute.xlu1 %1231 }
 0x727   :  { %v4640_v49 = vpop.eup %4639 }
 0x728   :  { %v992_v50 = vsel %vm157_vm2, %v4640_v49, 0.0  ;;  %v1230_v63 = vpop.permute.xlu1 %1229 }
 0x729   :  { %993 = vadd.xlane.f32.xlu0 %v992_v50 }
 0x73f   :  { %1151 = vrot.lane.b32.xlu0 %v4889_v12, %s5647_s30 }
 0x779   :  { %v991_v51 = vpop.xlane.xlu0 %990 }
 0x77a   :  { %4641 = vrcp.f32 %v991_v51 }
 0x77d   :  { %v1076_v52 = vpop.permute.xlu0 %1075 }
 0x77e   :  { %4241 = vmatpush3.msra.mxu1 %v1076_v52 }
 0x77f   :  { %4250 = vmatprep.subr.mxu1 %v4749_v8 }
 0x784   :  { %v4642_v53 = vpop.eup %4641 }
 0x785   :  { %v5031_v55 = vmul.f32 %v4642_v53, %v4638_v41  ;;  %v4493_v41 = vpack.c.bf16 %v1542_v40, %v1541_v38  ;;  %v1778_v38 = vld [vmem:[%s5632_s9 + $0x30] sm:$0xff] }
 0x787   :  { %4238 = vmatmul.mubr.msk.f32.vlgmr.msra.gmra.mrb[6].mxu0 %vm157_vm2, %v5031_v55 }
 0x788   :  { %4246 = vmatpush3.xpose.msk.msra.mxu0 %vm157_vm2, %v1154_v57  ;;  %4247 = vmatprep.mubr.msk.f32.mxu0 %vm4750_vm1, %v4749_v8 }
 0x789   :  { %4255 = vmatprep.subr.mxu0 %v4749_v8 }
 0x7b6   :  { %v994_v58 = vpop.xlane.xlu0 %993 }
 0x7b7   :  { %4643 = vrcp.f32 %v994_v58 }
 0x7ba   :  { %v1152_v59 = vpop.permute.xlu0 %1151 }
 0x7bb   :  { %4248 = vmatmul.mubr.msk.f32.vlgmr.msra.gmra.mrb[8].mxu0 %vm157_vm2, %v1152_v59 }
 0x7bc   :  { %4257 = vmatprep.mubr.msk.f32.mxu0 %vm4750_vm1, %v4749_v8 }
 0x7c1   :  { %v4644_v60 = vpop.eup %4643 }
 0x7c2   :  { %v5042_v62 = vmul.f32 %v4644_v60, %v4640_v49 }
 0x7c4   :  { %4243 = vmatmul.mubr.msk.f32.vlgmr.msra.gmra.mrb[16].mxu1 %vm157_vm2, %v5042_v62 }
 0x7c5   :  { %4251 = vmatpush3.xpose.msk.msra.mxu1 %vm157_vm2, %v1232_v61  ;;  %4252 = vmatprep.mubr.msk.f32.mxu1 %vm4750_vm1, %v4749_v8 }
 0x7c6   :  { %4260 = vmatprep.subr.mxu1 %v4749_v8 }
 0x7c8   :  { %4253 = vmatmul.mubr.msk.f32.vlgmr.msra.gmra.mrb[18].mxu1 %vm157_vm2, %v1230_v63 }
 0x7c9   :  { %4262 = vmatprep.mubr.msk.f32.mxu1 %vm4750_vm1, %v4749_v8 }
 0x85a   :  { %v1071_v0 = vpop.f32.mrb[6].mxu0 }
 0x85b   :  { %v4239_v1 = vpop.f32.mrb[7].mxu0 }
 0x88e   :  { %v1225_v2 = vpop.f32.mrb[8].mxu0 }
 0x88f   :  { %v1307_v3 = vsel %vm4909_vm3, %v1225_v2, -1e+09  ;;  %v4249_v4 = vpop.f32.mrb[9].mxu0 }
 0x890   :  { %v1309_v6 = vsel %vm157_vm2, %v1307_v3, -inf }
 0x891   :  { %1310 = vmax.xlane.f32.xlu0 %v1309_v6 }
 0x897   :  { %v1147_v9 = vpop.f32.mrb[16].mxu1 }
 0x898   :  { %v4244_v10 = vpop.f32.mrb[17].mxu1 }
 0x89b   :  { %v1303_v11 = vpop.f32.mrb[18].mxu1 }
 0x89c   :  { %v1308_v14 = vsel %vm4909_vm3, %v1303_v11, -1e+09  ;;  %v4254_v15 = vpop.f32.mrb[19].mxu1 }
 0x89d   :  { %v1312_v16 = vsel %vm157_vm2, %v1308_v14, -inf }
 0x89e   :  { %1313 = vmax.xlane.f32.xlu1 %v1312_v16 }
 0x8af   :  { %1331 = vrot.lane.b32.xlu1 %v4889_v12, %s5645_s0 }
 0x8b3   :  { %1511 = vrot.lane.b32.xlu1 %v5005_v26, %s5643_s17 }
 0x8b7   :  { %1513 = vrot.lane.b32.xlu1 %v5010_v32, %s5643_s17  ;;  %s5670_s17 = smov 16  }
 0x8bb   :  { %1521 = vrot.lane.b32.xlu1 %v1147_v9, %s5641_s18 }
 0x91e   :  { %v1311_v18 = vpop.xlane.xlu0 %1310 }
 0x91f   :  { %v1315_v20 = vsub.f32 %v1307_v3, %v1311_v18 }
 0x921   :  { %v1317_v21 = vmul.f32 1.442695, %v1315_v20 }
 0x923   :  { %4645 = vpow2.f32 %v1317_v21 }
 0x92b   :  { %v1314_v22 = vpop.xlane.xlu1 %1313 }
 0x92c   :  { %v1316_v23 = vsub.f32 %v1308_v14, %v1314_v22  ;;  %v1678_v22 = vld [vmem:[%s5630_s7] sm:$0xff] }
 0x92d   :  { %v4646_v25 = vpop.eup %4645 }
 0x92e   :  { %v1319_v27 = vmul.f32 1.442695, %v1316_v23  ;;  %v1321_v12 = vsel %vm157_vm2, %v4646_v25, 0.0  ;;  %v1679_v23 = vld [vmem:[%s5630_s7 + $0x8] sm:$0xff] }
 0x92f   :  { %v1332_v28 = vpop.permute.xlu1 %1331  ;;  %1322 = vadd.xlane.f32.xlu0 %v1321_v12  ;;  %v1681_v12 = vld [vmem:[%s5630_s7 + $0x18] sm:$0xff] }
 0x930   :  { %4647 = vpow2.f32 %v1319_v27  ;;  %4256 = vmatpush3.msra.mxu0 %v1332_v28  ;;  %v1680_v27 = vld [vmem:[%s5630_s7 + $0x10] sm:$0xff] }
 0x931   :  { %v4501_v28 = vpack.c.bf16 %v1681_v12, %v1680_v27 }
 0x933   :  { %v1512_v47 = vpop.permute.xlu1 %1511 }
 0x934   :  { %v1533_v50 = vsel %vm157_vm2, %v4960_v54, %v1512_v47  ;;  %v3944_v54 = vld [vmem:[%s5627_s4] ss:$0 sm:$0xff] }
 0x937   :  { %v1514_v57 = vpop.permute.xlu1 %1513 }
 0x938   :  { %v1534_v59 = vsel %vm157_vm2, %v4962_v56, %v1514_v57 }
 0x93a   :  { %v4648_v26 = vpop.eup %4647 }
 0x93b   :  { %v1324_v29 = vsel %vm157_vm2, %v4648_v26, 0.0  ;;  %v1522_v58 = vpop.permute.xlu1 %1521 }
 0x93c   :  { %1325 = vadd.xlane.f32.xlu0 %v1324_v29  ;;  %v1536_v60 = vsel %vm1503_vm5, %v1534_v59, %v1522_v58  ;;  %v1773_v29 = vld [vmem:[%s5632_s9 + $0x8] sm:$0xff] }
 0x952   :  { %1407 = vrot.lane.b32.xlu0 %v4893_v13, %s5645_s0  ;;  %v1539_v13 = vld [vmem:[%s5626_s3] sm:$0xff] }
 0x953   :  { %v4489_v39 = vpack.c.bf16 %v1540_v37, %v1539_v13  ;;  %v1777_v13 = vld [vmem:[%s5632_s9 + $0x28] sm:$0xff] }
 0x955   :  { %4490 = vmatprep.subr.bf16.mxu0 %v4489_v39 }
 0x956   :  { %1519 = vrot.lane.b32.xlu0 %v1071_v0, %s5641_s18 }
 0x9bc   :  { %v1323_v30 = vpop.xlane.xlu0 %1322 }
 0x9bd   :  { %4649 = vrcp.f32 %v1323_v30  ;;  %v1774_v30 = vld [vmem:[%s5632_s9 + $0x10] sm:$0xff] }
 0x9c7   :  { %v4650_v31 = vpop.eup %4649 }
 0x9c8   :  { %v5071_v32 = vmul.f32 %v4650_v31, %v4646_v25  ;;  %v4497_v25 = vpack.c.bf16 %v1679_v23, %v1678_v22 }
 0x9c9   :  { %v1326_v33 = vpop.xlane.xlu0 %1325 }
 0x9ca   :  { %4651 = vrcp.f32 %v1326_v33  ;;  %4258 = vmatmul.mubr.msk.f32.vlgmr.msra.gmra.mrb[10].mxu0 %vm157_vm2, %v5071_v32  ;;  %v1775_v33 = vld [vmem:[%s5632_s9 + $0x18] sm:$0xff] }
 0x9cb   :  { %4492 = vmatpush3.bf16.msra.mxu0 %v4489_v39  ;;  %v1779_v39 = vld [vmem:[%s5632_s9 + $0x38] sm:$0xff] }
 0x9cc   :  { %4494 = vmatprep.subr.bf16.mxu0 %v4493_v41  ;;  %v4517_v40 = vpack.c.bf16 %v1779_v39, %v1778_v38 }
 0x9cd   :  { %v1408_v34 = vpop.permute.xlu0 %1407 }
 0x9ce   :  { %4261 = vmatpush3.msra.mxu1 %v1408_v34  ;;  %v4509_v34 = vpack.c.bf16 %v1775_v33, %v1774_v30 }
 0x9cf   :  { %4496 = vmatpush3.bf16.msra.mxu0 %v4493_v41  ;;  %4498 = vmatprep.subr.bf16.mxu1 %v4497_v25  ;;  %v1780_v41 = vld [vmem:[%s5632_s9 + $0x40] sm:$0xff] }
 0x9d1   :  { %v1520_v49 = vpop.permute.xlu0 %1519 }
 0x9d2   :  { %v1535_v51 = vsel %vm1503_vm5, %v1533_v50, %v1520_v49  ;;  %v1784_v49 = vld [vmem:[%s5632_s9 + $0x60] sm:$0xff]  ;;  %v1785_v50 = vld [vmem:[%s5632_s9 + $0x68] sm:$0xff] }
 0x9d4   :  { %v4652_v35 = vpop.eup %4651 }
 0x9d5   :  { %v5075_v36 = vmul.f32 %v4652_v35, %v4648_v26  ;;  %v1772_v26 = vld [vmem:[%s5632_s9] sm:$0xff] }
 0x9d6   :  { %v4505_v31 = vpack.c.bf16 %v1773_v29, %v1772_v26  ;;  %v1776_v35 = vld [vmem:[%s5632_s9 + $0x20] sm:$0xff] }
 0x9d7   :  { %4263 = vmatmul.mubr.msk.f32.vlgmr.msra.gmra.mrb[20].mxu1 %vm157_vm2, %v5075_v36  ;;  %v4513_v37 = vpack.c.bf16 %v1777_v13, %v1776_v35 }
 0x9d8   :  { %4500 = vmatpush3.bf16.msra.mxu1 %v4497_v25  ;;  %4506 = vmatprep.subr.bf16.mxu0 %v4505_v31 }
 0x9d9   :  { %4502 = vmatprep.subr.bf16.mxu1 %v4501_v28 }
 0x9dc   :  { %4504 = vmatpush3.bf16.msra.mxu1 %v4501_v28 }
 0xa9d   :  { %v1403_v42 = vpop.f32.mrb[10].mxu0 }
 0xa9e   :  { %1527 = vrot.lane.b32.xlu0 %v1403_v42, %s5653_s19  ;;  %v4259_v43 = vpop.f32.mrb[11].mxu0  ;;  %v1781_v42 = vld [vmem:[%s5632_s9 + $0x48] sm:$0xff] }
 0xa9f   :  { %v4521_v43 = vpack.c.bf16 %v1781_v42, %v1780_v41  ;;  %v3955_v41 = vld [vmem:[%s5624_s1 + $0x20] sm:$0xff]  ;;  %v3956_v42 = vld [vmem:[%s5624_s1 + $0x28] sm:$0xff] }
 0xaaa   :  { %v1479_v44 = vpop.f32.mrb[20].mxu1 }
 0xaab   :  { %1529 = vrot.lane.b32.xlu1 %v1479_v44, %s5653_s19  ;;  %v4264_v45 = vpop.f32.mrb[21].mxu1  ;;  %v1782_v44 = vld [vmem:[%s5632_s9 + $0x50] sm:$0xff] }
 0xaac   :  { %v1783_v45 = vld [vmem:[%s5632_s9 + $0x58] sm:$0xff] }
 0xaad   :  { %v4525_v47 = vpack.c.bf16 %v1783_v45, %v1782_v44  ;;  %v3957_v44 = vld [vmem:[%s5624_s1 + $0x30] sm:$0xff]  ;;  %v3958_v45 = vld [vmem:[%s5624_s1 + $0x38] sm:$0xff] }
 0xb10   :  { %v1528_v52 = vpop.permute.xlu0 %1527 }
 0xb11   :  { %v1537_v53 = vsel %vm1506_vm4, %v1535_v51, %v1528_v52  ;;  %v4529_v51 = vpack.c.bf16 %v1785_v50, %v1784_v49 }
 0xb12   :  { %4273 = vmatprep.mubr.msk.f32.mxu0 %vm72_vm0, %v1537_v53 }
 0xb1d   :  { %v1530_v61 = vpop.permute.xlu1 %1529 }
 0xb1e   :  { %v1538_v63 = vsel %vm1506_vm4, %v1536_v60, %v1530_v61 }
 0xb1f   :  { %4274 = vmatmul.mubr.msk.f32.vlgmr.msra.gmra.mrb[12].mxu0 %vm72_vm0, %v1538_v63  ;;  %v3947_v63 = vld [vmem:[%s5628_s5] ss:$0 sm:$0xff] }
 0xb20   :  { %4508 = vmatpush3.bf16.msra.mxu0 %v4505_v31 }
 0xb21   :  { %4510 = vmatprep.subr.bf16.mxu0 %v4509_v34 }
 0xb24   :  { %4512 = vmatpush3.bf16.msra.mxu0 %v4509_v34 }
 0xb25   :  { %4514 = vmatprep.subr.bf16.mxu0 %v4513_v37 }
 0xb28   :  { %4516 = vmatpush3.bf16.msra.mxu0 %v4513_v37 }
 0xb29   :  { %4518 = vmatprep.subr.bf16.mxu0 %v4517_v40 }
 0xb2c   :  { %4520 = vmatpush3.bf16.msra.mxu0 %v4517_v40 }
 0xb2d   :  { %4522 = vmatprep.subr.bf16.mxu0 %v4521_v43 }
 0xb30   :  { %4524 = vmatpush3.bf16.msra.mxu0 %v4521_v43  ;;  %v4537_v43 = vpack.c.bf16 %v3956_v42, %v3955_v41 }
 0xb31   :  { %4526 = vmatprep.subr.bf16.mxu0 %v4525_v47 }
 0xb32   :  { %4538 = vmatprep.subr.bf16.mxu1 %v4537_v43 }
 0xb34   :  { %4528 = vmatpush3.bf16.msra.mxu0 %v4525_v47  ;;  %v4541_v47 = vpack.c.bf16 %v3958_v45, %v3957_v44 }
 0xb35   :  { %4530 = vmatprep.subr.bf16.mxu0 %v4529_v51 }
 0xb38   :  { %4532 = vmatpush3.bf16.msra.mxu0 %v4529_v51 }
 0xbf2   :  { %v4275_v0 = vpop.f32.mrb[12].mxu0 }
 0xbf3   :  { %v1628_v1 = vadd.f32 %v4275_v0, %v3944_v54  ;;  %v1622_v2 = vpop.f32.mrb[13].mxu0  ;;  %v3948_v0 = vld [vmem:[%s5629_s6] ss:$0 sm:$0xff] }
 0xbf4   :  { %v1623_v3 = vadd.f32 %v3944_v54, %v1622_v2 }
 0xbf5   :  { %v1632_v4 = vadd.f32 %v1628_v1, %v4876_v7 }
 0xbf6   :  { %v1631_v6 = vadd.f32 %v1623_v3, %v4869_v5 }
 0xbf7   :  { %v1638_v56 = vsel %vm72_vm0, %v1632_v4, 0.0 }
 0xbf8   :  { %1639 = vadd.xlane.f32.xlu1 %v1638_v56  ;;  %v1635_v9 = vsel %vm72_vm0, %v1631_v6, 0.0 }
 0xbf9   :  { %1636 = vadd.xlane.f32.xlu0 %v1635_v9  ;;  %v1786_v9 = vld [vmem:[%s5632_s9 + $0x70] sm:$0xff] }
 0xc85   :  { %v1640_v10 = vpop.xlane.xlu1 %1639 }
 0xc86   :  { %v1643_v11 = vmul.f32 0.03125, %v1640_v10  ;;  %v1637_v14 = vpop.xlane.xlu0 %1636  ;;  %v1787_v10 = vld [vmem:[%s5632_s9 + $0x78] sm:$0xff] }
 0xc87   :  { %v1642_v15 = vmul.f32 0.03125, %v1637_v14  ;;  %v3949_v14 = vld [vmem:[%s5631_s8] ss:$0 sm:$0xff] }
 0xc88   :  { %v5110_v16 = vsub.f32 %v1632_v4, %v1643_v11  ;;  %v4533_v11 = vpack.c.bf16 %v1787_v10, %v1786_v9 }
 0xc89   :  { %v1644_v18 = vsub.f32 %v1631_v6, %v1642_v15 }
 0xc8a   :  { %v1647_v7 = vmul.f32 %v5110_v16, %v5110_v16  ;;  %4534 = vmatprep.subr.bf16.mxu0 %v4533_v11 }
 0xc8b   :  { %v1646_v20 = vmul.f32 %v1644_v18, %v1644_v18  ;;  %4536 = vmatpush3.bf16.msra.mxu0 %v4533_v11 }
 0xc8c   :  { %v1651_v5 = vsel %vm72_vm0, %v1647_v7, 0.0  ;;  %4363 = vmatprep.subr.mxu0 %v4749_v8 }
 0xc8d   :  { %v1648_v21 = vsel %vm72_vm0, %v1646_v20, 0.0 }
 0xc8e   :  { %1649 = vadd.xlane.f32.xlu0 %v1648_v21 }
 0xc92   :  { %1652 = vadd.xlane.f32.xlu0 %v1651_v5  ;;  %v3952_v5 = vld [vmem:[%s5633_s10] ss:$0 sm:$0xff] }
 0xd1b   :  { %v1650_v52 = vpop.xlane.xlu0 %1649 }
 0xd1c   :  { %v1654_v53 = vmul.f32 0.03125, %v1650_v52 }
 0xd1e   :  { %v1656_v57 = vadd.f32 1e-05, %v1654_v53 }
 0xd1f   :  { %v1653_v58 = vpop.xlane.xlu0 %1652 }
 0xd20   :  { %4653 = vrsqrt.f32 %v1656_v57  ;;  %v1655_v59 = vmul.f32 0.03125, %v1653_v58 }
 0xd22   :  { %v1657_v60 = vadd.f32 1e-05, %v1655_v59  ;;  %v3953_v59 = vld [vmem:[%s5634_s11] ss:$0 sm:$0xff] }
 0xd24   :  { %4655 = vrsqrt.f32 %v1657_v60 }
 0xd2a   :  { %v4654_v61 = vpop.eup %4653 }
 0xd2b   :  { %v1660_v54 = vmul.f32 %v4654_v61, %v1644_v18 }
 0xd2d   :  { %v1668_v1 = vmul.f32 %v3947_v63, %v1660_v54  ;;  %v3954_v54 = vld [vmem:[%s5635_s12] ss:$0 sm:$0xff] }
 0xd2e   :  { %v4656_v2 = vpop.eup %4655 }
 0xd2f   :  { %v1661_v3 = vmul.f32 %v4656_v2, %v5110_v16  ;;  %v1676_v4 = vadd.f32 %v3948_v0, %v1668_v1 }
 0xd31   :  { %v1669_v6 = vmul.f32 %v3947_v63, %v1661_v3  ;;  %4284 = vmatprep.mubr.msk.f32.mxu1 %vm72_vm0, %v1676_v4 }
 0xd33   :  { %v1677_v56 = vadd.f32 %v3948_v0, %v1669_v6 }
 0xd35   :  { %4285 = vmatmul.mubr.msk.f32.vlgmr.msra.gmra.mrb[22].mxu1 %vm72_vm0, %v1677_v56 }
 0xd36   :  { %4540 = vmatpush3.bf16.msra.mxu1 %v4537_v43 }
 0xd37   :  { %4542 = vmatprep.subr.bf16.mxu1 %v4541_v47 }
 0xd3a   :  { %4544 = vmatpush3.bf16.msra.mxu1 %v4541_v47 }
 0xd3b   :  { %4333 = vmatprep.subr.mxu1 %v4749_v8 }
 0xe08   :  { %v4286_v15 = vpop.f32.mrb[22].mxu1 }
 0xe09   :  { %v1767_v16 = vadd.f32 %v4286_v15, %v3949_v14  ;;  %v1761_v18 = vpop.f32.mrb[23].mxu1 }
 0xe0a   :  { %v1762_v20 = vadd.f32 %v3949_v14, %v1761_v18 }
 0xe0b   :  { %v1771_v7 = vmax.f32 %v1767_v16, 0.0 }
 0xe0c   :  { %v1770_v21 = vmax.f32 %v1762_v20, 0.0 }
 0xe0e   :  { %4319 = vmatprep.mubr.f32.mxu0 %v1770_v21 }
 0xe0f   :  { %4320 = vmatmul.mubr.f32.vlgmr.msra.gmra.mrb[14].mxu0 %v1771_v7 }
 0xe10   :  { %4365 = vmatprep.mubr.msk.f32.mxu0 %vm4750_vm1, %v4749_v8 }
 0xee2   :  { %v4321_v22 = vpop.f32.mrb[14].mxu0 }
 0xee3   :  { %v1867_v23 = vadd.f32 %v4321_v22, %v3952_v5  ;;  %v1861_v25 = vpop.f32.mrb[15].mxu0 }
 0xee4   :  { %v1862_v27 = vadd.f32 %v3952_v5, %v1861_v25 }
 0xee5   :  { %v1871_v12 = vadd.f32 %v1867_v23, %v1677_v56 }
 0xee6   :  { %v1870_v28 = vadd.f32 %v1862_v27, %v1676_v4  ;;  %v3960_v4 = vld [vmem:[%s5625_s2 + $0x1] ss:$0 sm:$0xff]  ;;  %s5663_s2 = smov 80  }
 0xee7   :  { %v1877_v26 = vsel %vm72_vm0, %v1871_v12, 0.0 }
 0xee8   :  { %1878 = vadd.xlane.f32.xlu0 %v1877_v26  ;;  %v1874_v29 = vsel %vm72_vm0, %v1870_v28, 0.0 }
 0xee9   :  { %1875 = vadd.xlane.f32.xlu1 %v1874_v29 }
 0xf75   :  { %v1879_v30 = vpop.xlane.xlu0 %1878 }
 0xf76   :  { %v1881_v31 = vmul.f32 0.03125, %v1879_v30  ;;  %v1876_v33 = vpop.xlane.xlu1 %1875 }
 0xf77   :  { %v1880_v34 = vmul.f32 0.03125, %v1876_v33 }
 0xf78   :  { %v1883_v35 = vsub.f32 %v1871_v12, %v1881_v31 }
 0xf79   :  { %v1882_v13 = vsub.f32 %v1870_v28, %v1880_v34 }
 0xf7a   :  { %v1885_v37 = vmul.f32 %v1883_v35, %v1883_v35 }
 0xf7b   :  { %v1884_v38 = vmul.f32 %v1882_v13, %v1882_v13 }
 0xf7c   :  { %v1889_v39 = vsel %vm72_vm0, %v1885_v37, 0.0 }
 0xf7d   :  { %1890 = vadd.xlane.f32.xlu0 %v1889_v39  ;;  %v1886_v40 = vsel %vm72_vm0, %v1884_v38, 0.0 }
 0xf7e   :  { %1887 = vadd.xlane.f32.xlu1 %v1886_v40 }
0x100a   :  { %v1891_v49 = vpop.xlane.xlu0 %1890 }
0x100b   :  { %v1893_v50 = vmul.f32 0.03125, %v1891_v49  ;;  %v1888_v51 = vpop.xlane.xlu1 %1887 }
0x100c   :  { %v1892_v52 = vmul.f32 0.03125, %v1888_v51 }
0x100d   :  { %v1895_v53 = vadd.f32 1e-05, %v1893_v50 }
0x100e   :  { %v1894_v57 = vadd.f32 1e-05, %v1892_v52 }
0x100f   :  { %4657 = vrsqrt.f32 %v1895_v53 }
0x1010   :  { %4659 = vrsqrt.f32 %v1894_v57 }
0x1019   :  { %v4658_v58 = vpop.eup %4657 }
0x101a   :  { %v4660_v60 = vpop.eup %4659  ;;  %v1899_v61 = vmul.f32 %v4658_v58, %v1883_v35 }
0x101b   :  { %v1898_v63 = vmul.f32 %v4660_v60, %v1882_v13 }
0x101c   :  { %v1907_v0 = vmul.f32 %v3953_v59, %v1899_v61 }
0x101d   :  { %v1906_v1 = vmul.f32 %v3953_v59, %v1898_v63 }
0x101e   :  { %v5219_v3 = vadd.f32 %v3954_v54, %v1907_v0 }
0x101f   :  { %v5217_v2 = vadd.f32 %v3954_v54, %v1906_v1 }
0x1021   :  { %4330 = vmatprep.mubr.msk.f32.mxu1 %vm72_vm0, %v5217_v2 }
0x1022   :  { %4331 = vmatmul.mubr.msk.f32.vlgmr.msra.gmra.mrb[24].mxu1 %vm72_vm0, %v5219_v3 }
0x1023   :  { %4335 = vmatprep.mubr.msk.f32.mxu1 %vm4750_vm1, %v4749_v8 }
0x10f5   :  { %v4332_v6 = vpop.f32.mrb[24].mxu1 }
0x10f6   :  { %v5230_v56 = vadd.f32 %v4332_v6, %v3960_v4  ;;  %v2001_v9 = vpop.f32.mrb[25].mxu1 }
0x10f7   :  { %v5232_v10 = vadd.f32 %v3960_v4, %v2001_v9 }
0x10f8   :  { %2088 = vrot.lane.b32.xlu0 %v5230_v56, %s4751_s21 }
0x10f9   :  { %2011 = vrot.lane.b32.xlu1 %v5232_v10, %s4751_s21  ;;  %s5664_s21 = smov 112  }
0x116a   :  { %v2089_v14 = vpop.permute.xlu0 %2088 }
0x116b   :  { %v2012_v11 = vpop.permute.xlu1 %2011 }
0x116c   :  { %4334 = vmatpush3.xpose.msk.msra.mxu1 %vm157_vm2, %v2012_v11 }
0x116d   :  { %4338 = vmatprep.subr.mxu1 %v4749_v8 }
0x116f   :  { %4336 = vmatmul.mubr.msk.f32.vlgmr.msra.gmra.mrb[26].mxu1 %vm157_vm2, %v5232_v10 }
0x1170   :  { %4339 = vmatpush3.xpose.msk.msra.mxu1 %vm157_vm2, %v2089_v14  ;;  %4340 = vmatprep.mubr.msk.f32.mxu1 %vm4750_vm1, %v4749_v8 }
0x1171   :  { %4343 = vmatprep.subr.mxu1 %v4749_v8 }
0x1173   :  { %4341 = vmatmul.mubr.msk.f32.vlgmr.msra.gmra.mrb[28].mxu1 %vm157_vm2, %v5230_v56 }
0x1174   :  { %4345 = vmatprep.mubr.msk.f32.mxu1 %vm4750_vm1, %v4749_v8 }
0x1242   :  { %v2083_v15 = vpop.f32.mrb[26].mxu1 }
0x1243   :  { %v2164_v16 = vsel %vm4909_vm3, %v2083_v15, -1e+09  ;;  %v4337_v18 = vpop.f32.mrb[27].mxu1 }
0x1244   :  { %v2166_v20 = vsel %vm157_vm2, %v2164_v16, -inf }
0x1245   :  { %2167 = vmax.xlane.f32.xlu1 %v2166_v20 }
0x1246   :  { %v2160_v21 = vpop.f32.mrb[28].mxu1 }
0x1247   :  { %v2165_v7 = vsel %vm4909_vm3, %v2160_v21, -1e+09  ;;  %v4342_v5 = vpop.f32.mrb[29].mxu1 }
0x1248   :  { %v2169_v22 = vsel %vm157_vm2, %v2165_v7, -inf }
0x1249   :  { %2170 = vmax.xlane.f32.xlu0 %v2169_v22 }
0x1256   :  { %2188 = vrot.lane.b32.xlu1 %v5232_v10, %s4752_s22 }
0x12d2   :  { %v2168_v23 = vpop.xlane.xlu1 %2167 }
0x12d3   :  { %v2172_v25 = vsub.f32 %v2164_v16, %v2168_v23 }
0x12d5   :  { %v2174_v27 = vmul.f32 1.442695, %v2172_v25 }
0x12d6   :  { %v2189_v12 = vpop.permute.xlu1 %2188  ;;  %v2171_v28 = vpop.xlane.xlu0 %2170 }
0x12d7   :  { %4661 = vpow2.f32 %v2174_v27  ;;  %v2173_v26 = vsub.f32 %v2165_v7, %v2171_v28  ;;  %4344 = vmatpush3.msra.mxu1 %v2189_v12 }
0x12d8   :  { %4348 = vmatprep.subr.mxu1 %v4749_v8 }
0x12d9   :  { %v2176_v29 = vmul.f32 1.442695, %v2173_v26 }
0x12db   :  { %4663 = vpow2.f32 %v2176_v29 }
0x12e1   :  { %v4662_v30 = vpop.eup %4661 }
0x12e2   :  { %v2178_v31 = vsel %vm157_vm2, %v4662_v30, 0.0 }
0x12e3   :  { %2179 = vadd.xlane.f32.xlu1 %v2178_v31 }
0x12e5   :  { %v4664_v33 = vpop.eup %4663 }
0x12e6   :  { %v2181_v34 = vsel %vm157_vm2, %v4664_v33, 0.0 }
0x12e7   :  { %2182 = vadd.xlane.f32.xlu0 %v2181_v34 }
0x12f4   :  { %2342 = vrot.lane.b32.xlu1 %v5232_v10, %s4753_s23 }
0x12f8   :  { %2340 = vrot.lane.b32.xlu1 %v5232_v10, %s4754_s24 }
0x12fc   :  { %2418 = vrot.lane.b32.xlu1 %v5230_v56, %s4754_s24  ;;  %s5667_s24 = smov 104  }
0x12fd   :  { %2264 = vrot.lane.b32.xlu0 %v5230_v56, %s4752_s22  ;;  %s5665_s22 = smov 48  }
0x1301   :  { %2420 = vrot.lane.b32.xlu0 %v5230_v56, %s4753_s23  ;;  %s5666_s23 = smov 72  }
0x1370   :  { %v2180_v35 = vpop.xlane.xlu1 %2179 }
0x1371   :  { %4665 = vrcp.f32 %v2180_v35 }
0x1374   :  { %v2183_v13 = vpop.xlane.xlu0 %2182  ;;  %v2343_v41 = vpop.permute.xlu1 %2342 }
0x1375   :  { %4667 = vrcp.f32 %v2183_v13 }
0x1378   :  { %v2265_v39 = vpop.permute.xlu0 %2264  ;;  %v2341_v43 = vpop.permute.xlu1 %2340 }
0x137b   :  { %v4666_v37 = vpop.eup %4665 }
0x137c   :  { %v5271_v38 = vmul.f32 %v4666_v37, %v4662_v30  ;;  %v2421_v44 = vpop.permute.xlu0 %2420  ;;  %v2419_v45 = vpop.permute.xlu1 %2418 }
0x137e   :  { %4346 = vmatmul.mubr.msk.f32.vlgmr.msra.gmra.mrb[30].mxu1 %vm157_vm2, %v5271_v38 }
0x137f   :  { %v4668_v40 = vpop.eup %4667  ;;  %4349 = vmatpush3.msra.mxu1 %v2265_v39  ;;  %4350 = vmatprep.mubr.msk.f32.mxu1 %vm4750_vm1, %v4749_v8 }
0x1380   :  { %v5277_v42 = vmul.f32 %v4668_v40, %v4664_v33  ;;  %4353 = vmatprep.subr.mxu1 %v4749_v8 }
0x1382   :  { %4351 = vmatmul.mubr.msk.f32.vlgmr.msra.gmra.mrb[32].mxu1 %vm157_vm2, %v5277_v42 }
0x1383   :  { %4355 = vmatprep.mubr.msk.f32.mxu1 %vm4750_vm1, %v4749_v8 }
0x1386   :  { %4354 = vmatpush3.xpose.msk.msra.mxu1 %vm157_vm2, %v2343_v41 }
0x1387   :  { %4358 = vmatprep.subr.mxu1 %v4749_v8 }
0x1389   :  { %4356 = vmatmul.mubr.msk.f32.vlgmr.msra.gmra.mrb[34].mxu1 %vm157_vm2, %v2341_v43 }
0x138a   :  { %4359 = vmatpush3.xpose.msk.msra.mxu1 %vm157_vm2, %v2421_v44  ;;  %4360 = vmatprep.mubr.msk.f32.mxu1 %vm4750_vm1, %v4749_v8 }
0x138b   :  { %4368 = vmatprep.subr.mxu1 %v4749_v8 }
0x138d   :  { %4361 = vmatmul.mubr.msk.f32.vlgmr.msra.gmra.mrb[36].mxu1 %vm157_vm2, %v2419_v45 }
0x138e   :  { %4370 = vmatprep.mubr.msk.f32.mxu1 %vm4750_vm1, %v4749_v8 }
0x1451   :  { %v5294_v47 = vpop.f32.mrb[30].mxu1 }
0x1452   :  { %v4347_v49 = vpop.f32.mrb[31].mxu1 }
0x1455   :  { %v5296_v50 = vpop.f32.mrb[32].mxu1 }
0x1456   :  { %v4352_v51 = vpop.f32.mrb[33].mxu1 }
0x145c   :  { %v2414_v52 = vpop.f32.mrb[34].mxu1 }
0x145d   :  { %v2496_v53 = vsel %vm4909_vm3, %v2414_v52, -1e+09  ;;  %v4357_v57 = vpop.f32.mrb[35].mxu1 }
0x145e   :  { %v2498_v58 = vsel %vm157_vm2, %v2496_v53, -inf }
0x145f   :  { %2499 = vmax.xlane.f32.xlu0 %v2498_v58 }
0x1460   :  { %v2492_v59 = vpop.f32.mrb[36].mxu1 }
0x1461   :  { %v2497_v60 = vsel %vm4909_vm3, %v2492_v59, -1e+09  ;;  %v4362_v61 = vpop.f32.mrb[37].mxu1 }
0x1462   :  { %v2501_v63 = vsel %vm157_vm2, %v2497_v60, -inf }
0x1463   :  { %2502 = vmax.xlane.f32.xlu1 %v2501_v63 }
0x1474   :  { %2520 = vrot.lane.b32.xlu1 %v5232_v10, %s4755_s25 }
0x1475   :  { %2596 = vrot.lane.b32.xlu0 %v5230_v56, %s4755_s25  ;;  %s5668_s25 = smov 40  }
0x1478   :  { %2674 = vrot.lane.b32.xlu1 %v5232_v10, %s5663_s2 }
0x147c   :  { %2752 = vrot.lane.b32.xlu1 %v5230_v56, %s5663_s2 }
0x1480   :  { %2750 = vrot.lane.b32.xlu1 %v5230_v56, %s5664_s21 }
0x14ec   :  { %v2500_v54 = vpop.xlane.xlu0 %2499 }
0x14ed   :  { %v2504_v0 = vsub.f32 %v2496_v53, %v2500_v54 }
0x14ef   :  { %v2506_v1 = vmul.f32 1.442695, %v2504_v0 }
0x14f0   :  { %v2597_v4 = vpop.permute.xlu0 %2596  ;;  %v2503_v6 = vpop.xlane.xlu1 %2502 }
0x14f1   :  { %4669 = vpow2.f32 %v2506_v1  ;;  %v2505_v9 = vsub.f32 %v2497_v60, %v2503_v6  ;;  %4369 = vmatpush3.msra.mxu1 %v2597_v4 }
0x14f2   :  { %4378 = vmatprep.subr.mxu1 %v4749_v8 }
0x14f3   :  { %v2508_v11 = vmul.f32 1.442695, %v2505_v9 }
0x14f4   :  { %v2521_v14 = vpop.permute.xlu1 %2520 }
0x14f5   :  { %4671 = vpow2.f32 %v2508_v11  ;;  %4364 = vmatpush3.msra.mxu0 %v2521_v14 }
0x14f6   :  { %4373 = vmatprep.subr.mxu0 %v4749_v8 }
0x14f8   :  { %v2675_v5 = vpop.permute.xlu1 %2674 }
0x14fb   :  { %v4670_v15 = vpop.eup %4669 }
0x14fc   :  { %v2510_v16 = vsel %vm157_vm2, %v4670_v15, 0.0  ;;  %v2753_v27 = vpop.permute.xlu1 %2752 }
0x14fd   :  { %2511 = vadd.xlane.f32.xlu0 %v2510_v16 }
0x14ff   :  { %v4672_v18 = vpop.eup %4671 }
0x1500   :  { %v2513_v20 = vsel %vm157_vm2, %v4672_v18, 0.0  ;;  %v2751_v26 = vpop.permute.xlu1 %2750 }
0x1501   :  { %2514 = vadd.xlane.f32.xlu0 %v2513_v20 }
0x1517   :  { %2672 = vrot.lane.b32.xlu0 %v5232_v10, %s5664_s21 }
0x158a   :  { %v2512_v21 = vpop.xlane.xlu0 %2511 }
0x158b   :  { %4673 = vrcp.f32 %v2512_v21 }
0x158e   :  { %v2515_v7 = vpop.xlane.xlu0 %2514 }
0x158f   :  { %4675 = vrcp.f32 %v2515_v7 }
0x1592   :  { %v2673_v28 = vpop.permute.xlu0 %2672 }
0x1595   :  { %v4674_v22 = vpop.eup %4673 }
0x1596   :  { %v5320_v23 = vmul.f32 %v4674_v22, %v4670_v15 }
0x1598   :  { %4366 = vmatmul.mubr.msk.f32.vlgmr.msra.gmra.mrb[16].mxu0 %vm157_vm2, %v5320_v23 }
0x1599   :  { %v4676_v25 = vpop.eup %4675  ;;  %4374 = vmatpush3.xpose.msk.msra.mxu0 %vm157_vm2, %v2675_v5  ;;  %4375 = vmatprep.mubr.msk.f32.mxu0 %vm4750_vm1, %v4749_v8 }
0x159a   :  { %v5327_v12 = vmul.f32 %v4676_v25, %v4672_v18  ;;  %4383 = vmatprep.subr.mxu0 %v4749_v8 }
0x159c   :  { %4371 = vmatmul.mubr.msk.f32.vlgmr.msra.gmra.mrb[38].mxu1 %vm157_vm2, %v5327_v12  ;;  %4376 = vmatmul.mubr.msk.f32.vlgmr.msra.gmra.mrb[18].mxu0 %vm157_vm2, %v2673_v28 }
0x159d   :  { %4379 = vmatpush3.xpose.msk.msra.mxu1 %vm157_vm2, %v2753_v27  ;;  %4380 = vmatprep.mubr.msk.f32.mxu1 %vm4750_vm1, %v4749_v8 }
0x159e   :  { %4388 = vmatprep.subr.mxu1 %v4749_v8  ;;  %4385 = vmatprep.mubr.msk.f32.mxu0 %vm4750_vm1, %v4749_v8 }
0x15a0   :  { %4381 = vmatmul.mubr.msk.f32.vlgmr.msra.gmra.mrb[40].mxu1 %vm157_vm2, %v2751_v26 }
0x15a1   :  { %4390 = vmatprep.mubr.msk.f32.mxu1 %vm4750_vm1, %v4749_v8 }
0x166b   :  { %v5342_v29 = vpop.f32.mrb[16].mxu0 }
0x166c   :  { %v4367_v30 = vpop.f32.mrb[17].mxu0 }
0x166f   :  { %v5344_v31 = vpop.f32.mrb[38].mxu1  ;;  %v2746_v33 = vpop.f32.mrb[18].mxu0 }
0x1670   :  { %v2828_v34 = vsel %vm4909_vm3, %v2746_v33, -1e+09  ;;  %v4372_v35 = vpop.f32.mrb[39].mxu1  ;;  %v4377_v13 = vpop.f32.mrb[19].mxu0 }
0x1671   :  { %v2830_v37 = vsel %vm157_vm2, %v2828_v34, -inf }
0x1672   :  { %2831 = vmax.xlane.f32.xlu0 %v2830_v37 }
0x1673   :  { %v2824_v39 = vpop.f32.mrb[40].mxu1 }
0x1674   :  { %v2829_v40 = vsel %vm4909_vm3, %v2824_v39, -1e+09  ;;  %v4382_v41 = vpop.f32.mrb[41].mxu1 }
0x1675   :  { %v2833_v43 = vsel %vm157_vm2, %v2829_v40, -inf }
0x1676   :  { %2834 = vmax.xlane.f32.xlu1 %v2833_v43 }
0x1687   :  { %2852 = vrot.lane.b32.xlu1 %v5232_v10, %s5665_s22 }
0x1688   :  { %2928 = vrot.lane.b32.xlu0 %v5230_v56, %s5665_s22 }
0x168b   :  { %3006 = vrot.lane.b32.xlu1 %v5232_v10, %s5666_s23 }
0x168f   :  { %3084 = vrot.lane.b32.xlu1 %v5230_v56, %s5666_s23 }
0x1693   :  { %3082 = vrot.lane.b32.xlu1 %v5230_v56, %s5667_s24 }
0x16ff   :  { %v2832_v44 = vpop.xlane.xlu0 %2831 }
0x1700   :  { %v2836_v45 = vsub.f32 %v2828_v34, %v2832_v44 }
0x1702   :  { %v2838_v49 = vmul.f32 1.442695, %v2836_v45 }
0x1703   :  { %v2929_v51 = vpop.permute.xlu0 %2928  ;;  %v2835_v52 = vpop.xlane.xlu1 %2834 }
0x1704   :  { %4677 = vpow2.f32 %v2838_v49  ;;  %v2837_v53 = vsub.f32 %v2829_v40, %v2835_v52  ;;  %4389 = vmatpush3.msra.mxu1 %v2929_v51 }
0x1705   :  { %4398 = vmatprep.subr.mxu1 %v4749_v8 }
0x1706   :  { %v2840_v57 = vmul.f32 1.442695, %v2837_v53  ;;  %v3988_v53 = vld [vmem:[%s5626_s3 + $0x28] sm:$0xff] }
0x1707   :  { %v2853_v58 = vpop.permute.xlu1 %2852 }
0x1708   :  { %4679 = vpow2.f32 %v2840_v57  ;;  %4384 = vmatpush3.msra.mxu0 %v2853_v58  ;;  %v3989_v58 = vld [vmem:[%s5626_s3 + $0x30] sm:$0xff] }
0x1709   :  { %4393 = vmatprep.subr.mxu0 %v4749_v8 }
0x170b   :  { %v3007_v1 = vpop.permute.xlu1 %3006 }
0x170e   :  { %v4678_v59 = vpop.eup %4677 }
0x170f   :  { %v2842_v60 = vsel %vm157_vm2, %v4678_v59, 0.0  ;;  %v3085_v11 = vpop.permute.xlu1 %3084 }
0x1710   :  { %2843 = vadd.xlane.f32.xlu0 %v2842_v60 }
0x1712   :  { %v4680_v61 = vpop.eup %4679 }
0x1713   :  { %v2845_v63 = vsel %vm157_vm2, %v4680_v61, 0.0  ;;  %v3083_v16 = vpop.permute.xlu1 %3082 }
0x1714   :  { %2846 = vadd.xlane.f32.xlu0 %v2845_v63 }
0x172a   :  { %3004 = vrot.lane.b32.xlu0 %v5232_v10, %s5667_s24 }
0x179d   :  { %v2844_v54 = vpop.xlane.xlu0 %2843 }
0x179e   :  { %4681 = vrcp.f32 %v2844_v54 }
0x17a1   :  { %v2847_v0 = vpop.xlane.xlu0 %2846 }
0x17a2   :  { %4683 = vrcp.f32 %v2847_v0 }
0x17a5   :  { %v3005_v15 = vpop.permute.xlu0 %3004 }
0x17a8   :  { %v4682_v4 = vpop.eup %4681 }
0x17a9   :  { %v5368_v6 = vmul.f32 %v4682_v4, %v4678_v59  ;;  %v3990_v59 = vld [vmem:[%s5626_s3 + $0x38] sm:$0xff] }
0x17aa   :  { %v4549_v60 = vpack.c.bf16 %v3990_v59, %v3989_v58  ;;  %v4010_v58 = vld [vmem:[%s5632_s9 + $0x98] sm:$0xff] }
0x17ab   :  { %4386 = vmatmul.mubr.msk.f32.vlgmr.msra.gmra.mrb[20].mxu0 %vm157_vm2, %v5368_v6 }
0x17ac   :  { %v4684_v9 = vpop.eup %4683  ;;  %4394 = vmatpush3.xpose.msk.msra.mxu0 %vm157_vm2, %v3007_v1  ;;  %4395 = vmatprep.mubr.msk.f32.mxu0 %vm4750_vm1, %v4749_v8 }
0x17ad   :  { %v5375_v14 = vmul.f32 %v4684_v9, %v4680_v61  ;;  %4403 = vmatprep.subr.mxu0 %v4749_v8 }
0x17af   :  { %4391 = vmatmul.mubr.msk.f32.vlgmr.msra.gmra.mrb[42].mxu1 %vm157_vm2, %v5375_v14  ;;  %4396 = vmatmul.mubr.msk.f32.vlgmr.msra.gmra.mrb[22].mxu0 %vm157_vm2, %v3005_v15 }
0x17b0   :  { %4399 = vmatpush3.xpose.msk.msra.mxu1 %vm157_vm2, %v3085_v11  ;;  %4400 = vmatprep.mubr.msk.f32.mxu1 %vm4750_vm1, %v4749_v8 }
0x17b1   :  { %4408 = vmatprep.subr.mxu1 %v4749_v8  ;;  %4405 = vmatprep.mubr.msk.f32.mxu0 %vm4750_vm1, %v4749_v8 }
0x17b3   :  { %4401 = vmatmul.mubr.msk.f32.vlgmr.msra.gmra.mrb[44].mxu1 %vm157_vm2, %v3083_v16 }
0x17b4   :  { %4410 = vmatprep.mubr.msk.f32.mxu1 %vm4750_vm1, %v4749_v8 }
0x187e   :  { %v2924_v18 = vpop.f32.mrb[20].mxu0 }
0x187f   :  { %v4387_v20 = vpop.f32.mrb[21].mxu0 }
0x1882   :  { %v3000_v21 = vpop.f32.mrb[42].mxu1  ;;  %v3078_v7 = vpop.f32.mrb[22].mxu0 }
0x1883   :  { %v3160_v5 = vsel %vm4909_vm3, %v3078_v7, -1e+09  ;;  %v4392_v22 = vpop.f32.mrb[43].mxu1  ;;  %v4397_v25 = vpop.f32.mrb[23].mxu0 }
0x1884   :  { %v3162_v27 = vsel %vm157_vm2, %v3160_v5, -inf }
0x1885   :  { %3163 = vmax.xlane.f32.xlu0 %v3162_v27 }
0x1886   :  { %v3156_v28 = vpop.f32.mrb[44].mxu1 }
0x1887   :  { %v3161_v26 = vsel %vm4909_vm3, %v3156_v28, -1e+09  ;;  %v4402_v30 = vpop.f32.mrb[45].mxu1 }
0x1888   :  { %v3165_v33 = vsel %vm157_vm2, %v3161_v26, -inf }
0x1889   :  { %3166 = vmax.xlane.f32.xlu1 %v3165_v33 }
0x189a   :  { %3184 = vrot.lane.b32.xlu1 %v5232_v10, %s5668_s25 }
0x189e   :  { %3362 = vrot.lane.b32.xlu1 %v5342_v29, %s5669_s27 }
0x18a2   :  { %3364 = vrot.lane.b32.xlu1 %v5344_v31, %s5669_s27 }
0x18a6   :  { %3372 = vrot.lane.b32.xlu1 %v3000_v21, %s5670_s17 }
0x1912   :  { %v3164_v8 = vpop.xlane.xlu0 %3163 }
0x1913   :  { %v3168_v34 = vsub.f32 %v3160_v5, %v3164_v8 }
0x1915   :  { %v3170_v35 = vmul.f32 1.442695, %v3168_v34 }
0x1916   :  { %v3167_v19 = vpop.xlane.xlu1 %3166 }
0x1917   :  { %4685 = vpow2.f32 %v3170_v35  ;;  %v3169_v13 = vsub.f32 %v3161_v26, %v3167_v19 }
0x1919   :  { %v3172_v37 = vmul.f32 1.442695, %v3169_v13 }
0x191a   :  { %v3185_v39 = vpop.permute.xlu1 %3184 }
0x191b   :  { %4687 = vpow2.f32 %v3172_v37  ;;  %4404 = vmatpush3.msra.mxu0 %v3185_v39 }
0x191e   :  { %v3363_v1 = vpop.permute.xlu1 %3362 }
0x191f   :  { %v3384_v11 = vsel %vm157_vm2, %v5294_v47, %v3363_v1  ;;  %v3992_v47 = vld [vmem:[%s5627_s4 + $0x1] ss:$0 sm:$0xff] }
0x1921   :  { %v4686_v40 = vpop.eup %4685 }
0x1922   :  { %v3174_v10 = vsel %vm157_vm2, %v4686_v40, 0.0  ;;  %v3365_v4 = vpop.permute.xlu1 %3364 }
0x1923   :  { %3175 = vadd.xlane.f32.xlu0 %v3174_v10  ;;  %v3385_v21 = vsel %vm157_vm2, %v5296_v50, %v3365_v4  ;;  %v4015_v4 = vld [vmem:[%s5632_s9 + $0xc0] sm:$0xff] }
0x1925   :  { %v4688_v29 = vpop.eup %4687 }
0x1926   :  { %v3177_v41 = vsel %vm157_vm2, %v4688_v29, 0.0  ;;  %v3373_v15 = vpop.permute.xlu1 %3372 }
0x1927   :  { %3178 = vadd.xlane.f32.xlu0 %v3177_v41  ;;  %v3387_v7 = vsel %vm1503_vm5, %v3385_v21, %v3373_v15  ;;  %v4000_v41 = vld [vmem:[%s5630_s7 + $0x28] sm:$0xff]  ;;  %v4017_v15 = vld [vmem:[%s5632_s9 + $0xd0] sm:$0xff] }
0x1928   :  { %v4020_v21 = vld [vmem:[%s5632_s9 + $0xe8] sm:$0xff] }
0x193d   :  { %3260 = vrot.lane.b32.xlu0 %v5230_v56, %s5668_s25  ;;  %v3987_v56 = vld [vmem:[%s5626_s3 + $0x20] sm:$0xff] }
0x193e   :  { %v4545_v57 = vpack.c.bf16 %v3988_v53, %v3987_v56  ;;  %v4008_v56 = vld [vmem:[%s5632_s9 + $0x88] sm:$0xff]  ;;  %v4009_v53 = vld [vmem:[%s5632_s9 + $0x90] sm:$0xff] }
0x193f   :  { %v4565_v59 = vpack.c.bf16 %v4010_v58, %v4009_v53 }
0x1940   :  { %4546 = vmatprep.subr.bf16.mxu0 %v4545_v57 }
0x1941   :  { %3370 = vrot.lane.b32.xlu0 %v2924_v18, %s5670_s17 }
0x19b0   :  { %v3176_v31 = vpop.xlane.xlu0 %3175 }
0x19b1   :  { %4689 = vrcp.f32 %v3176_v31 }
0x19b4   :  { %v3179_v43 = vpop.xlane.xlu0 %3178 }
0x19b5   :  { %4691 = vrcp.f32 %v3179_v43  ;;  %v4001_v43 = vld [vmem:[%s5630_s7 + $0x30] sm:$0xff] }
0x19b8   :  { %v3261_v44 = vpop.permute.xlu0 %3260 }
0x19b9   :  { %4409 = vmatpush3.msra.mxu1 %v3261_v44  ;;  %v4002_v44 = vld [vmem:[%s5630_s7 + $0x38] sm:$0xff] }
0x19bb   :  { %v4690_v45 = vpop.eup %4689 }
0x19bc   :  { %v5408_v49 = vmul.f32 %v4690_v45, %v4686_v40  ;;  %v3371_v9 = vpop.permute.xlu0 %3370  ;;  %v4557_v45 = vpack.c.bf16 %v4002_v44, %v4001_v43 }
0x19bd   :  { %v3386_v16 = vsel %vm1503_vm5, %v3384_v11, %v3371_v9  ;;  %v4016_v9 = vld [vmem:[%s5632_s9 + $0xc8] sm:$0xff] }
0x19be   :  { %4406 = vmatmul.mubr.msk.f32.vlgmr.msra.gmra.mrb[24].mxu0 %vm157_vm2, %v5408_v49  ;;  %v4577_v11 = vpack.c.bf16 %v4016_v9, %v4015_v4 }
0x19bf   :  { %v4692_v51 = vpop.eup %4691  ;;  %4548 = vmatpush3.bf16.msra.mxu0 %v4545_v57 }
0x19c0   :  { %v5412_v52 = vmul.f32 %v4692_v51, %v4688_v29  ;;  %4550 = vmatprep.subr.bf16.mxu0 %v4549_v60  ;;  %v3999_v29 = vld [vmem:[%s5630_s7 + $0x20] sm:$0xff] }
0x19c1   :  { %v4553_v31 = vpack.c.bf16 %v4000_v41, %v3999_v29  ;;  %v4007_v51 = vld [vmem:[%s5632_s9 + $0x80] sm:$0xff] }
0x19c2   :  { %4411 = vmatmul.mubr.msk.f32.vlgmr.msra.gmra.mrb[46].mxu1 %vm157_vm2, %v5412_v52  ;;  %v4561_v57 = vpack.c.bf16 %v4008_v56, %v4007_v51 }
0x19c3   :  { %4552 = vmatpush3.bf16.msra.mxu0 %v4549_v60  ;;  %4554 = vmatprep.subr.bf16.mxu1 %v4553_v31  ;;  %v4011_v60 = vld [vmem:[%s5632_s9 + $0xa0] sm:$0xff] }
0x19c4   :  { %4556 = vmatpush3.bf16.msra.mxu1 %v4553_v31  ;;  %4562 = vmatprep.subr.bf16.mxu0 %v4561_v57 }
0x19c5   :  { %4558 = vmatprep.subr.bf16.mxu1 %v4557_v45 }
0x19c8   :  { %4560 = vmatpush3.bf16.msra.mxu1 %v4557_v45  ;;  %v4024_v45 = vld [vmem:[%s5633_s10 + $0x1] ss:$0 sm:$0xff] }
0x1a91   :  { %v3256_v61 = vpop.f32.mrb[24].mxu0 }
0x1a92   :  { %3378 = vrot.lane.b32.xlu0 %v3256_v61, %s5671_s26  ;;  %v4407_v63 = vpop.f32.mrb[25].mxu0  ;;  %v4012_v61 = vld [vmem:[%s5632_s9 + $0xa8] sm:$0xff] }
0x1a93   :  { %v4569_v63 = vpack.c.bf16 %v4012_v61, %v4011_v60 }
0x1a95   :  { %v3332_v54 = vpop.f32.mrb[46].mxu1 }
0x1a96   :  { %3380 = vrot.lane.b32.xlu1 %v3332_v54, %s5671_s26  ;;  %v4412_v0 = vpop.f32.mrb[47].mxu1  ;;  %v4013_v54 = vld [vmem:[%s5632_s9 + $0xb0] sm:$0xff] }
0x1a97   :  { %v4014_v0 = vld [vmem:[%s5632_s9 + $0xb8] sm:$0xff] }
0x1a98   :  { %v4573_v1 = vpack.c.bf16 %v4014_v0, %v4013_v54 }
0x1b04   :  { %v3379_v18 = vpop.permute.xlu0 %3378 }
0x1b05   :  { %v3388_v20 = vsel %vm1506_vm4, %v3386_v16, %v3379_v18  ;;  %v4018_v16 = vld [vmem:[%s5632_s9 + $0xd8] sm:$0xff] }
0x1b06   :  { %4421 = vmatprep.mubr.msk.f32.mxu0 %vm72_vm0, %v3388_v20  ;;  %v4581_v18 = vpack.c.bf16 %v4018_v16, %v4017_v15  ;;  %v4019_v20 = vld [vmem:[%s5632_s9 + $0xe0] sm:$0xff] }
0x1b08   :  { %v3381_v5 = vpop.permute.xlu1 %3380 }
0x1b09   :  { %v3389_v22 = vsel %vm1506_vm4, %v3387_v7, %v3381_v5  ;;  %v4585_v7 = vpack.c.bf16 %v4020_v21, %v4019_v20  ;;  %v3776_v20 = vld [vmem:[%s5636_s13] sm:$0xff] }
0x1b0a   :  { %4422 = vmatmul.mubr.msk.f32.vlgmr.msra.gmra.mrb[26].mxu0 %vm72_vm0, %v3389_v22 }
0x1b0b   :  { %4564 = vmatpush3.bf16.msra.mxu0 %v4561_v57 }
0x1b0c   :  { %4566 = vmatprep.subr.bf16.mxu0 %v4565_v59 }
0x1b0f   :  { %4568 = vmatpush3.bf16.msra.mxu0 %v4565_v59 }
0x1b10   :  { %4570 = vmatprep.subr.bf16.mxu0 %v4569_v63 }
0x1b13   :  { %4572 = vmatpush3.bf16.msra.mxu0 %v4569_v63 }
0x1b14   :  { %4574 = vmatprep.subr.bf16.mxu0 %v4573_v1 }
0x1b17   :  { %4576 = vmatpush3.bf16.msra.mxu0 %v4573_v1 }
0x1b18   :  { %4578 = vmatprep.subr.bf16.mxu0 %v4577_v11 }
0x1b1b   :  { %4580 = vmatpush3.bf16.msra.mxu0 %v4577_v11 }
0x1b1c   :  { %4582 = vmatprep.subr.bf16.mxu0 %v4581_v18 }
0x1b1f   :  { %4584 = vmatpush3.bf16.msra.mxu0 %v4581_v18 }
0x1b20   :  { %4586 = vmatprep.subr.bf16.mxu0 %v4585_v7 }
0x1b23   :  { %4588 = vmatpush3.bf16.msra.mxu0 %v4585_v7 }
0x1bdd   :  { %v4423_v25 = vpop.f32.mrb[26].mxu0 }
0x1bde   :  { %v3481_v27 = vadd.f32 %v4423_v25, %v3992_v47  ;;  %v3475_v28 = vpop.f32.mrb[27].mxu0 }
0x1bdf   :  { %v3476_v26 = vadd.f32 %v3992_v47, %v3475_v28 }
0x1be0   :  { %v3485_v30 = vadd.f32 %v3481_v27, %v5219_v3 }
0x1be1   :  { %v3484_v33 = vadd.f32 %v3476_v26, %v5217_v2 }
0x1be2   :  { %v3493_v50 = vsel %vm72_vm0, %v3485_v30, 0.0 }
0x1be3   :  { %3494 = vadd.xlane.f32.xlu1 %v3493_v50  ;;  %v3490_v8 = vsel %vm72_vm0, %v3484_v33, 0.0  ;;  %v3998_v50 = vld [vmem:[%s5629_s6 + $0x1] ss:$0 sm:$0xff] }
0x1be4   :  { %3491 = vadd.xlane.f32.xlu0 %v3490_v8 }
0x1c70   :  { %v3495_v34 = vpop.xlane.xlu1 %3494 }
0x1c71   :  { %v3497_v35 = vmul.f32 0.03125, %v3495_v34  ;;  %v3492_v19 = vpop.xlane.xlu0 %3491 }
0x1c72   :  { %v3496_v13 = vmul.f32 0.03125, %v3492_v19 }
0x1c73   :  { %v5447_v37 = vsub.f32 %v3485_v30, %v3497_v35  ;;  %v3997_v30 = vld [vmem:[%s5628_s5 + $0x1] ss:$0 sm:$0xff] }
0x1c74   :  { %v3498_v39 = vsub.f32 %v3484_v33, %v3496_v13 }
0x1c75   :  { %v3501_v3 = vmul.f32 %v5447_v37, %v5447_v37 }
0x1c76   :  { %v3500_v40 = vmul.f32 %v3498_v39, %v3498_v39 }
0x1c77   :  { %v3505_v2 = vsel %vm72_vm0, %v3501_v3, 0.0 }
0x1c78   :  { %v3502_v10 = vsel %vm72_vm0, %v3500_v40, 0.0 }
0x1c79   :  { %3503 = vadd.xlane.f32.xlu0 %v3502_v10  ;;  %v4021_v10 = vld [vmem:[%s5632_s9 + $0xf0] sm:$0xff] }
0x1c7d   :  { %3506 = vadd.xlane.f32.xlu0 %v3505_v2 }
0x1d06   :  { %v3504_v5 = vpop.xlane.xlu0 %3503 }
0x1d07   :  { %v3508_v22 = vmul.f32 0.03125, %v3504_v5 }
0x1d09   :  { %v3510_v47 = vadd.f32 1e-05, %v3508_v22 }
0x1d0a   :  { %v3507_v25 = vpop.xlane.xlu0 %3506 }
0x1d0b   :  { %4693 = vrsqrt.f32 %v3510_v47  ;;  %v3509_v27 = vmul.f32 0.03125, %v3507_v25 }
0x1d0d   :  { %v3511_v28 = vadd.f32 1e-05, %v3509_v27 }
0x1d0f   :  { %4695 = vrsqrt.f32 %v3511_v28 }
0x1d15   :  { %v4694_v26 = vpop.eup %4693 }
0x1d16   :  { %v3514_v33 = vmul.f32 %v4694_v26, %v3498_v39  ;;  %v4022_v39 = vld [vmem:[%s5632_s9 + $0xf8] sm:$0xff]  ;;  %v4027_v26 = vld [vmem:[%s5634_s11 + $0x1] ss:$0 sm:$0xff]  ;;  %s4766_s11 = smov [#allocation4]  }
0x1d17   :  { %v4589_v3 = vpack.c.bf16 %v4022_v39, %v4021_v10 }
0x1d18   :  { %v3522_v8 = vmul.f32 %v3997_v30, %v3514_v33 }
0x1d19   :  { %v4696_v34 = vpop.eup %4695  ;;  %4590 = vmatprep.subr.bf16.mxu0 %v4589_v3 }
0x1d1a   :  { %v3515_v35 = vmul.f32 %v4696_v34, %v5447_v37  ;;  %v3530_v19 = vadd.f32 %v3998_v50, %v3522_v8  ;;  %4592 = vmatpush3.bf16.msra.mxu0 %v4589_v3  ;;  %v4004_v37 = vld [vmem:[%s5631_s8 + $0x1] ss:$0 sm:$0xff] }
0x1d1c   :  { %v3523_v13 = vmul.f32 %v3997_v30, %v3515_v35  ;;  %4432 = vmatprep.mubr.msk.f32.mxu1 %vm72_vm0, %v3530_v19 }
0x1d1e   :  { %v3531_v40 = vadd.f32 %v3998_v50, %v3523_v13 }
0x1d20   :  { %4433 = vmatmul.mubr.msk.f32.vlgmr.msra.gmra.mrb[48].mxu1 %vm72_vm0, %v3531_v40 }
0x1df3   :  { %v4434_v2 = vpop.f32.mrb[48].mxu1 }
0x1df4   :  { %v3623_v29 = vadd.f32 %v4434_v2, %v4004_v37  ;;  %v3617_v41 = vpop.f32.mrb[49].mxu1 }
0x1df5   :  { %v3618_v31 = vadd.f32 %v4004_v37, %v3617_v41 }
0x1df6   :  { %v3627_v44 = vmax.f32 %v3623_v29, 0.0 }
0x1df7   :  { %v3626_v43 = vmax.f32 %v3618_v31, 0.0 }
0x1df9   :  { %4467 = vmatprep.mubr.f32.mxu0 %v3626_v43 }
0x1dfa   :  { %4468 = vmatmul.mubr.f32.vlgmr.msra.gmra.mrb[28].mxu0 %v3627_v44 }
0x1ecd   :  { %v4469_v51 = vpop.f32.mrb[28].mxu0 }
0x1ece   :  { %v3725_v56 = vadd.f32 %v4469_v51, %v4024_v45  ;;  %v3719_v53 = vpop.f32.mrb[29].mxu0 }
0x1ecf   :  { %v3720_v57 = vadd.f32 %v4024_v45, %v3719_v53 }
0x1ed0   :  { %v3729_v58 = vadd.f32 %v3725_v56, %v3531_v40 }
0x1ed1   :  { %v3728_v59 = vadd.f32 %v3720_v57, %v3530_v19  ;;  %v4028_v19 = vld [vmem:[%s5635_s12 + $0x1] ss:$0 sm:$0xff]  ;;  %s3902_s12 = sshll.u32 %s4766_s11, 4  ;;  %s3903_s12 = int_to_ptr.vmem [resolvable:$true] %s3902_s12 }
0x1ed2   :  { %v3737_v60 = vsel %vm72_vm0, %v3729_v58, 0.0  ;;  %s4701_s22 = scalar_lea.vmem %s3903_s12, 256  ;;  %p4706_p1 = scmp.lt.s32.totalorder %s3903_s12, %s3903_s12 }
0x1ed3   :  { %3738 = vadd.xlane.f32.xlu0 %v3737_v60  ;;  %v3734_v61 = vsel %vm72_vm0, %v3728_v59, 0.0  ;;  %p4702_p0 = scmp.ne.s32.totalorder %s3903_s12, %s4701_s22  ;;  %p4707_p2 = scmp.lt.s32.totalorder %s4701_s22, %s4701_s22 }
0x1ed4   :  { %3735 = vadd.xlane.f32.xlu1 %v3734_v61 }
0x1ed5   :  { %p4708_p3 = por %p4707_p2, %p4706_p1 }
0x1ed7   :  { %p4709_p4 = pnand %p4708_p3, %p4702_p0 }
0x1f60   :  { %v3739_v63 = vpop.xlane.xlu0 %3738 }
0x1f61   :  { %v3741_v54 = vmul.f32 0.03125, %v3739_v63  ;;  %v3736_v0 = vpop.xlane.xlu1 %3735 }
0x1f62   :  { %v3740_v1 = vmul.f32 0.03125, %v3736_v0 }
0x1f63   :  { %v3743_v4 = vsub.f32 %v3729_v58, %v3741_v54 }
0x1f64   :  { %v3742_v9 = vsub.f32 %v3728_v59, %v3740_v1 }
0x1f65   :  { %v3745_v11 = vmul.f32 %v3743_v4, %v3743_v4 }
0x1f66   :  { %v3744_v15 = vmul.f32 %v3742_v9, %v3742_v9 }
0x1f67   :  { %v3749_v16 = vsel %vm72_vm0, %v3745_v11, 0.0 }
0x1f68   :  { %3750 = vadd.xlane.f32.xlu0 %v3749_v16  ;;  %v3746_v18 = vsel %vm72_vm0, %v3744_v15, 0.0 }
0x1f69   :  { %3747 = vadd.xlane.f32.xlu1 %v3746_v18 }
0x1f7a   :  { %3336 = vrot.lane.b32.xlu1 %v5320_v23, %s5669_s27  ;;  %v3777_v23 = vld [vmem:[%s5636_s13 + $0x8] sm:$0xff] }
0x1f7b   :  { %v4593_v21 = vpack.c.bf16 %v3777_v23, %v3776_v20 }
0x1f7d   :  { %4594 = vmatprep.subr.bf16.mxu1 %v4593_v21 }
0x1f7e   :  { %3338 = vrot.lane.b32.xlu0 %v5327_v12, %s5669_s27  ;;  %3342 = vrot.lane.b32.xlu1 %v5368_v6, %s5670_s17  ;;  %v3778_v12 = vld [vmem:[%s5636_s13 + $0x10] sm:$0xff]  ;;  %v3779_v6 = vld [vmem:[%s5636_s13 + $0x18] sm:$0xff]  ;;  %s4765_s13 = smov 32  }
0x1f7f   :  { %4596 = vmatpush3.bf16.msra.mxu1 %v4593_v21 }
0x1f82   :  { %3348 = vrot.lane.b32.xlu0 %v5408_v49, %s5671_s26  ;;  %3344 = vrot.lane.b32.xlu1 %v5375_v14, %s5670_s17  ;;  %v4597_v14 = vpack.c.bf16 %v3779_v6, %v3778_v12 }
0x1f84   :  { %4598 = vmatprep.subr.bf16.mxu1 %v4597_v14 }
0x1f85   :  { %4600 = vmatpush3.bf16.msra.mxu1 %v4597_v14 }
0x1f86   :  { %1483 = vrot.lane.b32.xlu0 %v4983_v17, %s5669_s27  ;;  %3350 = vrot.lane.b32.xlu1 %v5412_v52, %s5671_s26 }
0x1f8a   :  { %1489 = vrot.lane.b32.xlu0 %v5031_v55, %s5670_s17  ;;  %1485 = vrot.lane.b32.xlu1 %v4994_v24, %s5669_s27 }
0x1f8e   :  { %1495 = vrot.lane.b32.xlu0 %v5071_v32, %s5671_s26  ;;  %1491 = vrot.lane.b32.xlu1 %v5042_v62, %s5670_s17 }
0x1f92   :  { %1497 = vrot.lane.b32.xlu1 %v5075_v36, %s5671_s26 }
0x1ff5   :  { %v3751_v17 = vpop.xlane.xlu0 %3750 }
0x1ff6   :  { %v3753_v49 = vmul.f32 0.03125, %v3751_v17  ;;  %v3748_v52 = vpop.xlane.xlu1 %3747 }
0x1ff7   :  { %v3752_v7 = vmul.f32 0.03125, %v3748_v52 }
0x1ff8   :  { %v3755_v5 = vadd.f32 1e-05, %v3753_v49 }
0x1ff9   :  { %v3754_v55 = vadd.f32 1e-05, %v3752_v7  ;;  %v3339_v22 = vpop.permute.xlu0 %3338 }
0x1ffa   :  { %4697 = vrsqrt.f32 %v3755_v5  ;;  %v3337_v24 = vpop.permute.xlu1 %3336  ;;  %v3355_v50 = vsel %vm157_vm2, %v5277_v42, %v3339_v22 }
0x1ffb   :  { %4699 = vrsqrt.f32 %v3754_v55  ;;  %v3354_v47 = vsel %vm157_vm2, %v5271_v38, %v3337_v24 }
0x1ffd   :  { %v3349_v25 = vpop.permute.xlu0 %3348 }
0x1ffe   :  { %v3343_v32 = vpop.permute.xlu1 %3342 }
0x1fff   :  { %v3356_v62 = vsel %vm1503_vm5, %v3354_v47, %v3343_v32 }
0x2000   :  { %v3358_v27 = vsel %vm1506_vm4, %v3356_v62, %v3349_v25 }
0x2001   :  { %3872 = vrot.lane.b32.xlu0 %v3358_v27, %s4765_s13  ;;  %v1484_v42 = vpop.permute.xlu0 %1483 }
0x2002   :  { %v3345_v36 = vpop.permute.xlu1 %3344  ;;  %v1501_v41 = vsel %vm157_vm2, %v4939_v46, %v1484_v42 }
0x2003   :  { %v3357_v38 = vsel %vm1503_vm5, %v3355_v50, %v3345_v36 }
0x2004   :  { %v4698_v28 = vpop.eup %4697 }
0x2005   :  { %v4700_v30 = vpop.eup %4699  ;;  %v3759_v33 = vmul.f32 %v4698_v28, %v3743_v4  ;;  %v1490_v3 = vpop.permute.xlu0 %1489 }
0x2006   :  { %v3351_v8 = vpop.permute.xlu1 %3350  ;;  %v3758_v34 = vmul.f32 %v4700_v30, %v3742_v9  ;;  %v1504_v31 = vsel %vm1503_vm5, %v1501_v41, %v1490_v3 }
0x2007   :  { %v3359_v35 = vsel %vm1506_vm4, %v3357_v38, %v3351_v8  ;;  %v3767_v13 = vmul.f32 %v4027_v26, %v3759_v33 }
0x2008   :  { %3874 = vrot.lane.b32.xlu1 %v3359_v35, %s4765_s13  ;;  %v3766_v40 = vmul.f32 %v4027_v26, %v3758_v34 }
0x2009   :  { %v3775_v39 = vadd.f32 %v4028_v19, %v3767_v13  ;;  %v1496_v2 = vpop.permute.xlu0 %1495 }
0x200a   :  { %v3774_v10 = vadd.f32 %v4028_v19, %v3766_v40  ;;  %v1486_v37 = vpop.permute.xlu1 %1485  ;;  %v1507_v43 = vsel %vm1506_vm4, %v1504_v31, %v1496_v2 }
0x200b   :  { %v1502_v53 = vsel %vm157_vm2, %v4945_v48, %v1486_v37 }
0x200c   :  { %4478 = vmatprep.mubr.msk.f32.mxu1 %vm72_vm0, %v3774_v10 }
0x200d   :  { %4479 = vmatmul.mubr.msk.f32.vlgmr.msra.gmra.mrb[50].mxu1 %vm72_vm0, %v3775_v39 }
0x200e   :  { %v1492_v29 = vpop.permute.xlu1 %1491 }
0x200f   :  { %v1505_v57 = vsel %vm1503_vm5, %v1502_v53, %v1492_v29 }
0x2012   :  { %v1498_v56 = vpop.permute.xlu1 %1497 }
0x2013   :  { %v1508_v46 = vsel %vm1506_vm4, %v1505_v57, %v1498_v56 }
0x2073   :  { %v3873_v44 = vpop.permute.xlu0 %3872 }
0x2074   :  { %v3878_v45 = vsel %vm72_vm0, %v1507_v43, %v3873_v44 }
0x2075   :  { %v3881_v51 = vsel %vm3880_vm6, %v3878_v45, 0.0 }
0x2076   :  { %3883 = vst [vmem:[#allocation4] sm:$0xff] %v3881_v51 }
0x207a   :  { %v3875_v58 = vpop.permute.xlu1 %3874 }
0x207b   :  { %v3879_v59 = vsel %vm72_vm0, %v1508_v46, %v3875_v58 }
0x207c   :  { %v3882_v60 = vsel %vm3880_vm6, %v3879_v59, 0.0 }
0x207d   :  { %3884 = vst [vmem:[#allocation4 + $0x8] sm:$0xff] %v3882_v60 }
0x207e   :  { %4712 = shalt.err (!%p4709_p4)
}
0x207f   :  { %s4713_s25 = scalar_lea.hbm %s5639_s16, 256 }
0x2080   :  { %p4714_p5 = scmp.ne.s32.totalorder %s5639_s16, %s4713_s25  ;;  %p4717_p6 = scmp.lt.u32.totalorder %s4713_s25, %s5639_s16 }
0x2082   :  { %p4719_p7 = pnand %p4717_p6, %p4714_p5 }
0x2084   :  { %4722 = shalt.err (!%p4719_p7)
}
0x2085   :  { %s4767_s6 = smov 128   ;;  %v4029_v48 = vld [vmem:[%s5637_s14] ss:$0 sm:$0xff]  ;;  %s4768_s9 = smov [#allocation2]  }
0x2086   :  { %3908 = dma.vmem_to_hbm [thread:$0]  %s3903_s12, 256, %s5639_s16, [#allocation5], %s4767_s6, %s4767_s6, %s5669_s27  }
0x2087   :  { %s3890_s10 = sshll.u32 %s4768_s9, 4  ;;  %s3891_s10 = int_to_ptr.vmem [resolvable:$true] %s3890_s10 }
0x2088   :  { %s4723_s30 = scalar_lea.vmem %s3891_s10, 256  ;;  %p4728_p9 = scmp.lt.s32.totalorder %s3891_s10, %s3891_s10 }
0x2089   :  { %p4724_p8 = scmp.ne.s32.totalorder %s3891_s10, %s4723_s30  ;;  %p4729_p10 = scmp.lt.s32.totalorder %s4723_s30, %s4723_s30 }
0x208b   :  { %p4730_p11 = por %p4729_p10, %p4728_p9 }
0x208d   :  { %p4731_p12 = pnand %p4730_p11, %p4724_p8 }
0x20e0   :  { %v4480_v61 = vpop.f32.mrb[50].mxu1 }
0x20e1   :  { %v3865_v63 = vadd.f32 %v4480_v61, %v4029_v48  ;;  %v3859_v54 = vpop.f32.mrb[51].mxu1 }
0x20e2   :  { %v3860_v0 = vadd.f32 %v4029_v48, %v3859_v54 }
0x20e3   :  { %3869 = vst [vmem:[#allocation2 + $0x8] sm:$0xff] %v3865_v63 }
0x20e4   :  { %3868 = vst [vmem:[#allocation2] sm:$0xff] %v3860_v0 }
0x20e5   :  { %4734 = shalt.err (!%p4731_p12)
}
0x20e6   :  { %s4735_s14 = scalar_lea.hbm %s5638_s15, 256 }
0x20e7   :  { %p4736_p13 = scmp.ne.s32.totalorder %s5638_s15, %s4735_s14  ;;  %p4739_p0 = scmp.lt.u32.totalorder %s4735_s14, %s5638_s15 }
0x20e9   :  { %p4741_p1 = pnand %p4739_p0, %p4736_p13 }
0x20eb   :  { %4744 = shalt.err (!%p4741_p1)
}
0x20ec   :  { %3896 = dma.vmem_to_hbm [thread:$0]  %s3891_s10, 256, %s5638_s15, [#allocation3], %s4767_s6, %s4767_s6, %s5669_s27  }
0x20ed   :  { %4745 = dma.done.wait [#allocation3], 256  }
0x20ee   :  { %4746 = vsyncadd [#allocation3], 4294967040 }
0x20ef   :  { %4747 = dma.done.wait [#allocation5], 256  }
0x20f0   :  { %4748 = vsyncadd [#allocation5], 4294967040 }
0x20f1   :  { %3915 = vsyncpa [#allocation3], 1 }
0x20f2   :  { %3916 = vsyncpa [#allocation5], 1 }

</bundles_post_ra>
